<compile_context>
chip_gen: v7x
topology: tpu7x:2x2x1
jax: 0.10.0
libtpu: 0.0.40
codegen_flags: <defaults>
</compile_context>

<pallas_src>
import functools

import numpy as np
import jax
import jax.numpy as jnp
from jax.experimental import pallas as pl
from jax.experimental.pallas import tpu as pltpu


# ---------------------------------------------------------------------------
# Pallas kernel: both deconv+BN+ReLU layers for one batch element.
# ---------------------------------------------------------------------------

def _fused_deconv2_kernel(x_ref, w1_ref, b1_ref, w2_ref, b2_ref, mask_ref,
                          out_ref, patch1_ref, ys_ref, patch2_ref, *,
                          cin_pad, cmid, m_lanes, shifts1, l2_copies, ys_off):
    """One grid step = one image, both layers fused.

    x_ref:      (1, Cin_pad, L1)  padded layer-1 input, spatial flattened on lanes
    w1_ref:     (R1, K1)          layer-1 polyphase weights (BN scale folded in)
    b1_ref:     (R1, 1)           layer-1 folded conv-bias + BN shift
    w2_ref:     (R2, K2)          layer-2 double-polyphase weights (scale folded)
    b2_ref:     (R2, 1)           layer-2 folded conv-bias + BN shift
    mask_ref:   (1, M)            1.0 on valid quotient columns, 0.0 on lane pad
    out_ref:    (1, R2, M)        phase-major layer-2 output (lane-dense)
    patch1_ref: (K1, M)  VMEM     layer-1 im2col slab
    ys_ref:     (R1, LY) VMEM     bordered quotient-grid slab holding the
                                  layer-1 activation (= layer-2 input)
    patch2_ref: (K2, M)  VMEM     layer-2 im2col slab
    """
    # ---- layer 1 im2col: each tap is a pure lane shift of the flat input ----
    for t, sh in enumerate(shifts1):                           # static, unrolled
        patch1_ref[pl.ds(t * cin_pad, cin_pad), :] = x_ref[0, :, pl.ds(sh, m_lanes)]

    acc1 = jnp.dot(w1_ref[...], patch1_ref[...],
                   preferred_element_type=jnp.float32)         # (R1, M)
    # folded BN shift + ReLU; zero the out-of-image quotient columns so they
    # behave as the zero border / padding of layer 2's input.
    y1 = jnp.maximum(acc1 + b1_ref[...], 0.0) * mask_ref[...]

    # ---- park the layer-1 activation in the bordered quotient slab ----------
    rows_y, l_y = ys_ref.shape
    ys_ref[:, pl.ds(0, ys_off)] = jnp.zeros((rows_y, ys_off), ys_ref.dtype)
    tail = l_y - ys_off - m_lanes
    if tail > 0:
        ys_ref[:, pl.ds(ys_off + m_lanes, tail)] = jnp.zeros((rows_y, tail),
                                                             ys_ref.dtype)
    ys_ref[:, pl.ds(ys_off, m_lanes)] = y1.astype(ys_ref.dtype)

    # ---- layer 2 im2col straight from the slab (pure lane shifts) -----------
    for dst, src, sh in l2_copies:                             # static, unrolled
        patch2_ref[pl.ds(dst, cmid), :] = ys_ref[pl.ds(src, cmid),
                                                 pl.ds(sh, m_lanes)]

    acc2 = jnp.dot(w2_ref[...], patch2_ref[...],
                   preferred_element_type=jnp.float32)         # (R2, M)
    y2 = jnp.maximum(acc2 + b2_ref[...], 0.0)
    out_ref[0] = y2.astype(out_ref.dtype)


# ---------------------------------------------------------------------------
# Static polyphase bookkeeping + weight folding (host side, trace time)
# ---------------------------------------------------------------------------

def _phase_axis_info(k, s, p):
    k0 = [(r + p) % s for r in range(s)]
    nt = [((k - k0[r] + s - 1) // s) if k0[r] < k else 0 for r in range(s)]
    d0 = [(r + p) // s for r in range(s)]
    pad_lo = max(0, max(nt[r] - 1 - d0[r] for r in range(s)))
    t_taps = pad_lo + max(d0) + 1
    return k0, nt, d0, pad_lo, t_taps


def _axis_tap_table(k, s, p):
    """Per output phase r: list of (unified tap index t, kernel index kk)."""
    k0, nt, d0, pad_lo, t_taps = _phase_axis_info(k, s, p)
    table = [[(pad_lo + d0[r] - j, k0[r] + s * j) for j in range(nt[r])]
             for r in range(s)]
    return table, t_taps, pad_lo


def _build_l1_weights(w_iohw, scale, table, t_taps, cin_pad):
    """(s*s*Cout, T*T*Cin_pad) polyphase weights, BN scale folded into rows."""
    cin, cout, _, _ = w_iohw.shape
    w = np.transpose(np.asarray(w_iohw), (1, 0, 2, 3))       # (Cout, Cin, kH, kW)
    sc = np.asarray(scale)[:, None]
    s = len(table)
    out = np.zeros((s * s * cout, t_taps * t_taps * cin_pad), np.float32)
    for ry in range(s):
        for rx in range(s):
            r0 = (ry * s + rx) * cout
            for ty, ky in table[ry]:
                for tx, kx in table[rx]:
                    c0 = (ty * t_taps + tx) * cin_pad
                    out[r0:r0 + cout, c0:c0 + cin] = w[:, :, ky, kx] * sc
    return jnp.asarray(out)


def _build_l2_weights(w_iohw, scale, table, pad_lo, combos, cmid):
    """(4*4*Cout, |combos|^2*Cmid) double-polyphase weights (scale folded)."""
    cin, cout, _, _ = w_iohw.shape
    assert cin == cmid
    w = np.transpose(np.asarray(w_iohw), (1, 0, 2, 3))       # (Cout, Cin, kH, kW)
    sc = np.asarray(scale)[:, None]
    s = len(table)                         # 2
    nph = 2 * s                            # 4 output phases per axis
    ncmb = len(combos)
    cidx = {c: i for i, c in enumerate(combos)}
    out = np.zeros((nph * nph * cout, ncmb * ncmb * cmid), np.float32)
    for sy in range(2):
        for ry in range(s):
            py = 2 * sy + ry
            for sx in range(2):
                for rx in range(s):
                    px = 2 * sx + rx
                    r0 = (py * nph + px) * cout
                    for ty, ky in table[ry]:
                        ey = sy + ty - pad_lo
                        iy = cidx[(ey % 2, ey // 2)]
                        for tx, kx in table[rx]:
                            ex = sx + tx - pad_lo
                            ix = cidx[(ex % 2, ex // 2)]
                            c0 = (iy * ncmb + ix) * cmid
                            out[r0:r0 + cout, c0:c0 + cin] += w[:, :, ky, kx] * sc
    return jnp.asarray(out)


def _round_up(a, m):
    return -(-a // m) * m


# ---------------------------------------------------------------------------
# Wrapper: ConvsTransposeBase.forward (forward_simple), NCHW in / NCHW out.
# ---------------------------------------------------------------------------

def convs_transpose_forward(x_nchw, layer_params, *, strides, paddings,
                            output_paddings, eps=1e-5):
    if len(layer_params) != 2 or list(strides) != [2, 2] or \
       list(output_paddings) != [1, 1] or paddings[0] != paddings[1]:
        # TODO(synk): chain fused pairs / per-layer fallback for other configs.
        raise NotImplementedError("fused kernel specialised to the 2-layer, "
                                  "stride-2 module defaults")
    n, c0, h, w = x_nchw.shape
    w1 = layer_params[0]["weight"]                  # (C0, C1, k, k)
    w2 = layer_params[1]["weight"]                  # (C1, C2, k, k)
    k = w1.shape[2]
    p = paddings[0]
    if w1.shape[3] != k or w2.shape[2] != k or w2.shape[3] != k:
        raise NotImplementedError("square kernels only")
    c1, c2 = w1.shape[1], w2.shape[1]
    s = 2

    # folded eval-mode BatchNorm (scale goes into the weights, shift stays)
    def _fold(pp):
        sc = pp["gamma"] / jnp.sqrt(pp["running_var"] + eps)
        sh = (pp["bias"] - pp["running_mean"]) * sc + pp["beta"]
        return sc, sh
    scale1, shift1 = _fold(layer_params[0])
    scale2, shift2 = _fold(layer_params[1])

    # polyphase tap table (identical for both layers: same k, s, p)
    table, t_taps, pad_lo = _axis_tap_table(k, s, p)

    # layer-2 double polyphase: split its quotient q2 = 2*m + sigma so every
    # tap becomes a fixed (source phase, lane shift) on layer-1's quotient grid.
    combos = []
    for sig in range(2):
        for t in range(t_taps):
            e = sig + t - pad_lo
            c = (e % 2, e // 2)
            if c not in combos:
                combos.append(c)
    b_lo = max(0, -min(du for _, du in combos))
    b_hi = max(0, max(du for _, du in combos))

    # shared quotient-grid lane geometry (lane-dense: hq*wq multiple of 128)
    hq = h
    wq = _round_up(max(w + t_taps - 1, w + b_lo + b_hi), 8)
    m_lanes = hq * wq                                          # 16*24 = 384

    cin_pad = _round_up(c0, 8)                                 # 8-sublane groups
    cmid = c1
    r1, k1 = s * s * c1, t_taps * t_taps * cin_pad             # (32, 72)
    r2, k2 = (2 * s) ** 2 * c2, len(combos) ** 2 * cmid        # (64, 128)

    shifts1 = tuple(ty * wq + tx for ty in range(t_taps) for tx in range(t_taps))
    ys_off = _round_up(b_lo * wq + b_lo, 128)                  # aligned slab store
    l2_copies = tuple(((iy * len(combos) + ix) * cmid,
                       (cy * 2 + cx) * cmid,
                       ys_off + dy * wq + dx)
                      for iy, (cy, dy) in enumerate(combos)
                      for ix, (cx, dx) in enumerate(combos))

    hp1 = h + t_taps - 1
    l1 = _round_up(max(max(shifts1) + m_lanes, hp1 * wq), 128)
    l_y = _round_up(max(max(sh for *_, sh in l2_copies) + m_lanes,
                        ys_off + m_lanes), 128)

    # host-side input prep (once): channel pad to 8, ~1px spatial pad, flatten.
    xp = jnp.pad(x_nchw, ((0, 0), (0, cin_pad - c0),
                          (pad_lo, hp1 - h - pad_lo),
                          (pad_lo, wq - w - pad_lo)))
    xflat = jnp.pad(xp.reshape(n, cin_pad, hp1 * wq),
                    ((0, 0), (0, 0), (0, l1 - hp1 * wq)))

    w1_all = _build_l1_weights(w1, scale1, table, t_taps, cin_pad)
    w2_all = _build_l2_weights(w2, scale2, table, pad_lo, combos, cmid)
    b1 = jnp.tile(shift1, s * s).reshape(r1, 1).astype(jnp.float32)
    b2 = jnp.tile(shift2, (2 * s) ** 2).reshape(r2, 1).astype(jnp.float32)
    lane = np.arange(m_lanes)
    mask = jnp.asarray(((lane % wq) < w).astype(np.float32).reshape(1, m_lanes))

    kernel = functools.partial(
        _fused_deconv2_kernel, cin_pad=cin_pad, cmid=cmid, m_lanes=m_lanes,
        shifts1=shifts1, l2_copies=l2_copies, ys_off=ys_off)

    y = pl.pallas_call(
        kernel,
        out_shape=jax.ShapeDtypeStruct((n, r2, m_lanes), x_nchw.dtype),
        grid_spec=pltpu.PrefetchScalarGridSpec(
            num_scalar_prefetch=0,
            grid=(n,),
            in_specs=[
                pl.BlockSpec((1, cin_pad, l1), lambda i: (i, 0, 0)),
                pl.BlockSpec((r1, k1), lambda i: (0, 0)),
                pl.BlockSpec((r1, 1), lambda i: (0, 0)),
                pl.BlockSpec((r2, k2), lambda i: (0, 0)),
                pl.BlockSpec((r2, 1), lambda i: (0, 0)),
                pl.BlockSpec((1, m_lanes), lambda i: (0, 0)),
            ],
            out_specs=pl.BlockSpec((1, r2, m_lanes), lambda i: (i, 0, 0)),
            scratch_shapes=[
                pltpu.VMEM((k1, m_lanes), jnp.float32),     # layer-1 im2col
                pltpu.VMEM((r1, l_y), jnp.float32),         # bordered activation slab
                pltpu.VMEM((k2, m_lanes), jnp.float32),     # layer-2 im2col
            ],
        ),
        compiler_params=pltpu.CompilerParams(
            dimension_semantics=("parallel",),
            vmem_limit_bytes=16 * 1024 * 1024),
    )(xflat, w1_all, b1, w2_all, b2, mask)

    # final depth-to-space (factor 4) + drop the lane-pad quotient columns
    # (squash_function=None, target_shape=None -> nothing else to do).
    nph = 2 * s
    y = y.reshape(n, nph, nph, c2, hq, wq)[..., :w]
    y = y.transpose(0, 3, 4, 1, 5, 2).reshape(n, c2, nph * h, nph * w)
    return y


# ---------------------------------------------------------------------------
# Pure-JAX reference + deterministic params
# ---------------------------------------------------------------------------

def reference_forward(x_nchw, layer_params, *, strides, paddings,
                      output_paddings, eps=1e-5):
    """Pure-JAX reference (lax.conv_general_dilated with lhs_dilation)."""
    x = jnp.transpose(x_nchw, (0, 2, 3, 1))
    for i, p in enumerate(layer_params):
        W_iohw = p["weight"]
        kH = W_iohw.shape[2]
        s, pad, op = strides[i], paddings[i], output_paddings[i]
        Wc = jnp.transpose(W_iohw[:, :, ::-1, ::-1], (2, 3, 0, 1))
        lo = kH - 1 - pad
        y = jax.lax.conv_general_dilated(
            x, Wc, window_strides=(1, 1),
            padding=[(lo, lo + op), (lo, lo + op)],
            lhs_dilation=(s, s),
            dimension_numbers=("NHWC", "HWIO", "NHWC"),
            precision=jax.lax.Precision.HIGHEST)
        scale = p["gamma"] / jnp.sqrt(p["running_var"] + eps)
        y = (y + p["bias"] - p["running_mean"]) * scale + p["beta"]
        y = jnp.maximum(y, 0.0)
        x = y
    return jnp.transpose(x, (0, 3, 1, 2))


def init_params(key, input_channels, channels, kernel):
    """Deterministic parameter init (shapes match nn.ConvTranspose2d / BN)."""
    params = []
    prev = input_channels
    for c in channels:
        key, kw, kb = jax.random.split(key, 3)
        bound = 1.0 / np.sqrt(prev * kernel * kernel)
        params.append(dict(
            weight=jax.random.uniform(kw, (prev, c, kernel, kernel),
                                      jnp.float32, -bound, bound),
            bias=jax.random.uniform(kb, (c,), jnp.float32, -bound, bound),
            gamma=1.0 + 0.1 * jnp.arange(c, dtype=jnp.float32),
            beta=0.05 * jnp.arange(c, dtype=jnp.float32),
            running_mean=jnp.zeros((c,), jnp.float32),
            running_var=jnp.ones((c,), jnp.float32),
        ))
        prev = c
    return params


if __name__ == "__main__":
    key = jax.random.PRNGKey(0)
    k_x, k_p = jax.random.split(key)

    # Small, module-consistent shapes (ConvsTransposeBase defaults).
    N, C_in, H, W = 2, 4, 16, 16
    channels = [8, 4]
    kernel = 5
    strides = [2, 2]
    paddings = [kernel // 2, kernel // 2]          # default: div_shape(kernel, 2)
    output_paddings = [s - 1 for s in strides]     # per module: stride - 1

    x = jax.random.normal(k_x, (N, C_in, H, W), jnp.float32)   # NCHW
    params = init_params(k_p, C_in, channels, kernel)

    out = convs_transpose_forward(x, params, strides=strides,
                                  paddings=paddings,
                                  output_paddings=output_paddings)
    out = jax.block_until_ready(out)

    ref = reference_forward(x, params, strides=strides, paddings=paddings,
                            output_paddings=output_paddings)
    ref = jax.block_until_ready(ref)

    assert out.shape == (N, channels[-1], 64, 64), out.shape
    np.testing.assert_allclose(np.asarray(out), np.asarray(ref),
                               rtol=2e-2, atol=2e-2)
    print("KERNEL_OK")
</pallas_src>

<mosaic_0001>
module attributes {stable_mosaic.version = 11 : i64} {
  func.func @_fused_deconv2_kernel(%arg0: i32, %arg1: memref<1x8x512xf32, #tpu.memory_space<vmem>>, %arg2: memref<32x72xf32, #tpu.memory_space<vmem>>, %arg3: memref<32x1xf32, #tpu.memory_space<vmem>>, %arg4: memref<64x128xf32, #tpu.memory_space<vmem>>, %arg5: memref<64x1xf32, #tpu.memory_space<vmem>>, %arg6: memref<1x384xf32, #tpu.memory_space<vmem>>, %arg7: memref<1x64x384xf32, #tpu.memory_space<vmem>>, %arg8: memref<72x384xf32, #tpu.memory_space<vmem>>, %arg9: memref<32x640xf32, #tpu.memory_space<vmem>>, %arg10: memref<128x384xf32, #tpu.memory_space<vmem>>) attributes {dimension_semantics = [#tpu.dimension_semantics<parallel>], iteration_bounds = array<i64: 2>, scalar_prefetch = 0 : i64, scratch_operands = 3 : i64, tpu.core_type = #tpu.core_type<tc>, window_params = [{transform_indices = @transform_0, window_bounds = array<i64: 1, 8, 512>}, {pipeline_mode = #tpu.pipeline_mode<synchronous>, transform_indices = @transform_1, window_bounds = array<i64: 32, 72>}, {pipeline_mode = #tpu.pipeline_mode<synchronous>, transform_indices = @transform_2, window_bounds = array<i64: 32, 1>}, {pipeline_mode = #tpu.pipeline_mode<synchronous>, transform_indices = @transform_3, window_bounds = array<i64: 64, 128>}, {pipeline_mode = #tpu.pipeline_mode<synchronous>, transform_indices = @transform_4, window_bounds = array<i64: 64, 1>}, {pipeline_mode = #tpu.pipeline_mode<synchronous>, transform_indices = @transform_5, window_bounds = array<i64: 1, 384>}, {transform_indices = @transform_6, window_bounds = array<i64: 1, 64, 384>}]} {
    %c0 = arith.constant 0 : index
    %c0_0 = arith.constant 0 : index
    %c0_1 = arith.constant 0 : index
    %0 = vector.load %arg1[%c0, %c0_0, %c0_1] : memref<1x8x512xf32, #tpu.memory_space<vmem>>, vector<1x8x384xf32>
    %1 = vector.shape_cast %0 : vector<1x8x384xf32> to vector<8x384xf32>
    %c0_2 = arith.constant 0 : index
    %c0_3 = arith.constant 0 : index
    %2 = vector.load %arg8[%c0_2, %c0_3] : memref<72x384xf32, #tpu.memory_space<vmem>>, vector<8x384xf32>
    tpu.vector_store %arg8[%c0_2, %c0_3], %1 {strides = array<i32>} : memref<72x384xf32, #tpu.memory_space<vmem>>, vector<8x384xf32>,
    %c0_4 = arith.constant 0 : index
    %c0_5 = arith.constant 0 : index
    %c1 = arith.constant 1 : index
    %3 = vector.load %arg1[%c0_4, %c0_5, %c1] : memref<1x8x512xf32, #tpu.memory_space<vmem>>, vector<1x8x384xf32>
    %4 = vector.shape_cast %3 : vector<1x8x384xf32> to vector<8x384xf32>
    %c8 = arith.constant 8 : index
    %c0_6 = arith.constant 0 : index
    %5 = vector.load %arg8[%c8, %c0_6] : memref<72x384xf32, #tpu.memory_space<vmem>>, vector<8x384xf32>
    tpu.vector_store %arg8[%c8, %c0_6], %4 {strides = array<i32>} : memref<72x384xf32, #tpu.memory_space<vmem>>, vector<8x384xf32>,
    %c0_7 = arith.constant 0 : index
    %c0_8 = arith.constant 0 : index
    %c2 = arith.constant 2 : index
    %6 = vector.load %arg1[%c0_7, %c0_8, %c2] : memref<1x8x512xf32, #tpu.memory_space<vmem>>, vector<1x8x384xf32>
    %7 = vector.shape_cast %6 : vector<1x8x384xf32> to vector<8x384xf32>
    %c16 = arith.constant 16 : index
    %c0_9 = arith.constant 0 : index
    %8 = vector.load %arg8[%c16, %c0_9] : memref<72x384xf32, #tpu.memory_space<vmem>>, vector<8x384xf32>
    tpu.vector_store %arg8[%c16, %c0_9], %7 {strides = array<i32>} : memref<72x384xf32, #tpu.memory_space<vmem>>, vector<8x384xf32>,
    %c0_10 = arith.constant 0 : index
    %c0_11 = arith.constant 0 : index
    %c24 = arith.constant 24 : index
    %9 = vector.load %arg1[%c0_10, %c0_11, %c24] : memref<1x8x512xf32, #tpu.memory_space<vmem>>, vector<1x8x384xf32>
    %10 = vector.shape_cast %9 : vector<1x8x384xf32> to vector<8x384xf32>
    %c24_12 = arith.constant 24 : index
    %c0_13 = arith.constant 0 : index
    %11 = vector.load %arg8[%c24_12, %c0_13] : memref<72x384xf32, #tpu.memory_space<vmem>>, vector<8x384xf32>
    tpu.vector_store %arg8[%c24_12, %c0_13], %10 {strides = array<i32>} : memref<72x384xf32, #tpu.memory_space<vmem>>, vector<8x384xf32>,
    %c0_14 = arith.constant 0 : index
    %c0_15 = arith.constant 0 : index
    %c25 = arith.constant 25 : index
    %12 = vector.load %arg1[%c0_14, %c0_15, %c25] : memref<1x8x512xf32, #tpu.memory_space<vmem>>, vector<1x8x384xf32>
    %13 = vector.shape_cast %12 : vector<1x8x384xf32> to vector<8x384xf32>
    %c32 = arith.constant 32 : index
    %c0_16 = arith.constant 0 : index
    %14 = vector.load %arg8[%c32, %c0_16] : memref<72x384xf32, #tpu.memory_space<vmem>>, vector<8x384xf32>
    tpu.vector_store %arg8[%c32, %c0_16], %13 {strides = array<i32>} : memref<72x384xf32, #tpu.memory_space<vmem>>, vector<8x384xf32>,
    %c0_17 = arith.constant 0 : index
    %c0_18 = arith.constant 0 : index
    %c26 = arith.constant 26 : index
    %15 = vector.load %arg1[%c0_17, %c0_18, %c26] : memref<1x8x512xf32, #tpu.memory_space<vmem>>, vector<1x8x384xf32>
    %16 = vector.shape_cast %15 : vector<1x8x384xf32> to vector<8x384xf32>
    %c40 = arith.constant 40 : index
    %c0_19 = arith.constant 0 : index
    %17 = vector.load %arg8[%c40, %c0_19] : memref<72x384xf32, #tpu.memory_space<vmem>>, vector<8x384xf32>
    tpu.vector_store %arg8[%c40, %c0_19], %16 {strides = array<i32>} : memref<72x384xf32, #tpu.memory_space<vmem>>, vector<8x384xf32>,
    %c0_20 = arith.constant 0 : index
    %c0_21 = arith.constant 0 : index
    %c48 = arith.constant 48 : index
    %18 = vector.load %arg1[%c0_20, %c0_21, %c48] : memref<1x8x512xf32, #tpu.memory_space<vmem>>, vector<1x8x384xf32>
    %19 = vector.shape_cast %18 : vector<1x8x384xf32> to vector<8x384xf32>
    %c48_22 = arith.constant 48 : index
    %c0_23 = arith.constant 0 : index
    %20 = vector.load %arg8[%c48_22, %c0_23] : memref<72x384xf32, #tpu.memory_space<vmem>>, vector<8x384xf32>
    tpu.vector_store %arg8[%c48_22, %c0_23], %19 {strides = array<i32>} : memref<72x384xf32, #tpu.memory_space<vmem>>, vector<8x384xf32>,
    %c0_24 = arith.constant 0 : index
    %c0_25 = arith.constant 0 : index
    %c49 = arith.constant 49 : index
    %21 = vector.load %arg1[%c0_24, %c0_25, %c49] : memref<1x8x512xf32, #tpu.memory_space<vmem>>, vector<1x8x384xf32>
    %22 = vector.shape_cast %21 : vector<1x8x384xf32> to vector<8x384xf32>
    %c56 = arith.constant 56 : index
    %c0_26 = arith.constant 0 : index
    %23 = vector.load %arg8[%c56, %c0_26] : memref<72x384xf32, #tpu.memory_space<vmem>>, vector<8x384xf32>
    tpu.vector_store %arg8[%c56, %c0_26], %22 {strides = array<i32>} : memref<72x384xf32, #tpu.memory_space<vmem>>, vector<8x384xf32>,
    %c0_27 = arith.constant 0 : index
    %c0_28 = arith.constant 0 : index
    %c50 = arith.constant 50 : index
    %24 = vector.load %arg1[%c0_27, %c0_28, %c50] : memref<1x8x512xf32, #tpu.memory_space<vmem>>, vector<1x8x384xf32>
    %25 = vector.shape_cast %24 : vector<1x8x384xf32> to vector<8x384xf32>
    %c64 = arith.constant 64 : index
    %c0_29 = arith.constant 0 : index
    %26 = vector.load %arg8[%c64, %c0_29] : memref<72x384xf32, #tpu.memory_space<vmem>>, vector<8x384xf32>
    tpu.vector_store %arg8[%c64, %c0_29], %25 {strides = array<i32>} : memref<72x384xf32, #tpu.memory_space<vmem>>, vector<8x384xf32>,
    %c0_30 = arith.constant 0 : index
    %c0_31 = arith.constant 0 : index
    %27 = vector.load %arg2[%c0_30, %c0_31] : memref<32x72xf32, #tpu.memory_space<vmem>>, vector<32x72xf32>
    %c0_32 = arith.constant 0 : index
    %c0_33 = arith.constant 0 : index
    %28 = vector.load %arg8[%c0_32, %c0_33] : memref<72x384xf32, #tpu.memory_space<vmem>>, vector<72x384xf32>
    %cst = arith.constant dense<0.000000e+00> : vector<32x384xf32>
    %29 = tpu.matmul %27, %28, %cst {dimension_numbers = #tpu.dot_dimension_numbers<[1], [0], [0], [1], [0, 0, 1, 1], [], []>} : vector<32x72xf32>, vector<72x384xf32>, vector<32x384xf32> -> vector<32x384xf32>
    %c0_34 = arith.constant 0 : index
    %c0_35 = arith.constant 0 : index
    %30 = vector.load %arg3[%c0_34, %c0_35] : memref<32x1xf32, #tpu.memory_space<vmem>>, vector<32x1xf32>
    %31 = vector.broadcast %30 : vector<32x1xf32> to vector<32x384xf32>
    %32 = arith.addf %29, %31 : vector<32x384xf32>
    %cst_36 = arith.constant 0.000000e+00 : f32
    %33 = vector.broadcast %cst_36 : f32 to vector<32x384xf32>
    %34 = arith.maximumf %32, %33 : vector<32x384xf32>
    %c0_37 = arith.constant 0 : index
    %c0_38 = arith.constant 0 : index
    %35 = vector.load %arg6[%c0_37, %c0_38] : memref<1x384xf32, #tpu.memory_space<vmem>>, vector<1x384xf32>
    %36 = vector.broadcast %35 : vector<1x384xf32> to vector<32x384xf32>
    %37 = arith.mulf %34, %36 : vector<32x384xf32>
    %cst_39 = arith.constant 0.000000e+00 : f32
    %38 = vector.broadcast %cst_39 : f32 to vector<32x128xf32>
    %c0_40 = arith.constant 0 : index
    %c0_41 = arith.constant 0 : index
    %39 = vector.load %arg9[%c0_40, %c0_41] : memref<32x640xf32, #tpu.memory_space<vmem>>, vector<32x128xf32>
    tpu.vector_store %arg9[%c0_40, %c0_41], %38 {strides = array<i32>} : memref<32x640xf32, #tpu.memory_space<vmem>>, vector<32x128xf32>,
    %cst_42 = arith.constant 0.000000e+00 : f32
    %40 = vector.broadcast %cst_42 : f32 to vector<32x128xf32>
    %c0_43 = arith.constant 0 : index
    %c512 = arith.constant 512 : index
    %41 = vector.load %arg9[%c0_43, %c512] : memref<32x640xf32, #tpu.memory_space<vmem>>, vector<32x128xf32>
    tpu.vector_store %arg9[%c0_43, %c512], %40 {strides = array<i32>} : memref<32x640xf32, #tpu.memory_space<vmem>>, vector<32x128xf32>,
    %c0_44 = arith.constant 0 : index
    %c128 = arith.constant 128 : index
    %42 = vector.load %arg9[%c0_44, %c128] : memref<32x640xf32, #tpu.memory_space<vmem>>, vector<32x384xf32>
    tpu.vector_store %arg9[%c0_44, %c128], %37 {strides = array<i32>} : memref<32x640xf32, #tpu.memory_space<vmem>>, vector<32x384xf32>,
    %c24_45 = arith.constant 24 : index
    %c103 = arith.constant 103 : index
    %43 = vector.load %arg9[%c24_45, %c103] : memref<32x640xf32, #tpu.memory_space<vmem>>, vector<8x384xf32>
    %c0_46 = arith.constant 0 : index
    %c0_47 = arith.constant 0 : index
    %44 = vector.load %arg10[%c0_46, %c0_47] : memref<128x384xf32, #tpu.memory_space<vmem>>, vector<8x384xf32>
    tpu.vector_store %arg10[%c0_46, %c0_47], %43 {strides = array<i32>} : memref<128x384xf32, #tpu.memory_space<vmem>>, vector<8x384xf32>,
    %c16_48 = arith.constant 16 : index
    %c104 = arith.constant 104 : index
    %45 = vector.load %arg9[%c16_48, %c104] : memref<32x640xf32, #tpu.memory_space<vmem>>, vector<8x384xf32>
    %c8_49 = arith.constant 8 : index
    %c0_50 = arith.constant 0 : index
    %46 = vector.load %arg10[%c8_49, %c0_50] : memref<128x384xf32, #tpu.memory_space<vmem>>, vector<8x384xf32>
    tpu.vector_store %arg10[%c8_49, %c0_50], %45 {strides = array<i32>} : memref<128x384xf32, #tpu.memory_space<vmem>>, vector<8x384xf32>,
    %c24_51 = arith.constant 24 : index
    %c104_52 = arith.constant 104 : index
    %47 = vector.load %arg9[%c24_51, %c104_52] : memref<32x640xf32, #tpu.memory_space<vmem>>, vector<8x384xf32>
    %c16_53 = arith.constant 16 : index
    %c0_54 = arith.constant 0 : index
    %48 = vector.load %arg10[%c16_53, %c0_54] : memref<128x384xf32, #tpu.memory_space<vmem>>, vector<8x384xf32>
    tpu.vector_store %arg10[%c16_53, %c0_54], %47 {strides = array<i32>} : memref<128x384xf32, #tpu.memory_space<vmem>>, vector<8x384xf32>,
    %c16_55 = arith.constant 16 : index
    %c105 = arith.constant 105 : index
    %49 = vector.load %arg9[%c16_55, %c105] : memref<32x640xf32, #tpu.memory_space<vmem>>, vector<8x384xf32>
    %c24_56 = arith.constant 24 : index
    %c0_57 = arith.constant 0 : index
    %50 = vector.load %arg10[%c24_56, %c0_57] : memref<128x384xf32, #tpu.memory_space<vmem>>, vector<8x384xf32>
    tpu.vector_store %arg10[%c24_56, %c0_57], %49 {strides = array<i32>} : memref<128x384xf32, #tpu.memory_space<vmem>>, vector<8x384xf32>,
    %c8_58 = arith.constant 8 : index
    %c127 = arith.constant 127 : index
    %51 = vector.load %arg9[%c8_58, %c127] : memref<32x640xf32, #tpu.memory_space<vmem>>, vector<8x384xf32>
    %c32_59 = arith.constant 32 : index
    %c0_60 = arith.constant 0 : index
    %52 = vector.load %arg10[%c32_59, %c0_60] : memref<128x384xf32, #tpu.memory_space<vmem>>, vector<8x384xf32>
    tpu.vector_store %arg10[%c32_59, %c0_60], %51 {strides = array<i32>} : memref<128x384xf32, #tpu.memory_space<vmem>>, vector<8x384xf32>,
    %c0_61 = arith.constant 0 : index
    %c128_62 = arith.constant 128 : index
    %53 = vector.load %arg9[%c0_61, %c128_62] : memref<32x640xf32, #tpu.memory_space<vmem>>, vector<8x384xf32>
    %c40_63 = arith.constant 40 : index
    %c0_64 = arith.constant 0 : index
    %54 = vector.load %arg10[%c40_63, %c0_64] : memref<128x384xf32, #tpu.memory_space<vmem>>, vector<8x384xf32>
    tpu.vector_store %arg10[%c40_63, %c0_64], %53 {strides = array<i32>} : memref<128x384xf32, #tpu.memory_space<vmem>>, vector<8x384xf32>,
    %c8_65 = arith.constant 8 : index
    %c128_66 = arith.constant 128 : index
    %55 = vector.load %arg9[%c8_65, %c128_66] : memref<32x640xf32, #tpu.memory_space<vmem>>, vector<8x384xf32>
    %c48_67 = arith.constant 48 : index
    %c0_68 = arith.constant 0 : index
    %56 = vector.load %arg10[%c48_67, %c0_68] : memref<128x384xf32, #tpu.memory_space<vmem>>, vector<8x384xf32>
    tpu.vector_store %arg10[%c48_67, %c0_68], %55 {strides = array<i32>} : memref<128x384xf32, #tpu.memory_space<vmem>>, vector<8x384xf32>,
    %c0_69 = arith.constant 0 : index
    %c129 = arith.constant 129 : index
    %57 = vector.load %arg9[%c0_69, %c129] : memref<32x640xf32, #tpu.memory_space<vmem>>, vector<8x384xf32>
    %c56_70 = arith.constant 56 : index
    %c0_71 = arith.constant 0 : index
    %58 = vector.load %arg10[%c56_70, %c0_71] : memref<128x384xf32, #tpu.memory_space<vmem>>, vector<8x384xf32>
    tpu.vector_store %arg10[%c56_70, %c0_71], %57 {strides = array<i32>} : memref<128x384xf32, #tpu.memory_space<vmem>>, vector<8x384xf32>,
    %c24_72 = arith.constant 24 : index
    %c127_73 = arith.constant 127 : index
    %59 = vector.load %arg9[%c24_72, %c127_73] : memref<32x640xf32, #tpu.memory_space<vmem>>, vector<8x384xf32>
    %c64_74 = arith.constant 64 : index
    %c0_75 = arith.constant 0 : index
    %60 = vector.load %arg10[%c64_74, %c0_75] : memref<128x384xf32, #tpu.memory_space<vmem>>, vector<8x384xf32>
    tpu.vector_store %arg10[%c64_74, %c0_75], %59 {strides = array<i32>} : memref<128x384xf32, #tpu.memory_space<vmem>>, vector<8x384xf32>,
    %c16_76 = arith.constant 16 : index
    %c128_77 = arith.constant 128 : index
    %61 = vector.load %arg9[%c16_76, %c128_77] : memref<32x640xf32, #tpu.memory_space<vmem>>, vector<8x384xf32>
    %c72 = arith.constant 72 : index
    %c0_78 = arith.constant 0 : index
    %62 = vector.load %arg10[%c72, %c0_78] : memref<128x384xf32, #tpu.memory_space<vmem>>, vector<8x384xf32>
    tpu.vector_store %arg10[%c72, %c0_78], %61 {strides = array<i32>} : memref<128x384xf32, #tpu.memory_space<vmem>>, vector<8x384xf32>,
    %c24_79 = arith.constant 24 : index
    %c128_80 = arith.constant 128 : index
    %63 = vector.load %arg9[%c24_79, %c128_80] : memref<32x640xf32, #tpu.memory_space<vmem>>, vector<8x384xf32>
    %c80 = arith.constant 80 : index
    %c0_81 = arith.constant 0 : index
    %64 = vector.load %arg10[%c80, %c0_81] : memref<128x384xf32, #tpu.memory_space<vmem>>, vector<8x384xf32>
    tpu.vector_store %arg10[%c80, %c0_81], %63 {strides = array<i32>} : memref<128x384xf32, #tpu.memory_space<vmem>>, vector<8x384xf32>,
    %c16_82 = arith.constant 16 : index
    %c129_83 = arith.constant 129 : index
    %65 = vector.load %arg9[%c16_82, %c129_83] : memref<32x640xf32, #tpu.memory_space<vmem>>, vector<8x384xf32>
    %c88 = arith.constant 88 : index
    %c0_84 = arith.constant 0 : index
    %66 = vector.load %arg10[%c88, %c0_84] : memref<128x384xf32, #tpu.memory_space<vmem>>, vector<8x384xf32>
    tpu.vector_store %arg10[%c88, %c0_84], %65 {strides = array<i32>} : memref<128x384xf32, #tpu.memory_space<vmem>>, vector<8x384xf32>,
    %c8_85 = arith.constant 8 : index
    %c151 = arith.constant 151 : index
    %67 = vector.load %arg9[%c8_85, %c151] : memref<32x640xf32, #tpu.memory_space<vmem>>, vector<8x384xf32>
    %c96 = arith.constant 96 : index
    %c0_86 = arith.constant 0 : index
    %68 = vector.load %arg10[%c96, %c0_86] : memref<128x384xf32, #tpu.memory_space<vmem>>, vector<8x384xf32>
    tpu.vector_store %arg10[%c96, %c0_86], %67 {strides = array<i32>} : memref<128x384xf32, #tpu.memory_space<vmem>>, vector<8x384xf32>,
    %c0_87 = arith.constant 0 : index
    %c152 = arith.constant 152 : index
    %69 = vector.load %arg9[%c0_87, %c152] : memref<32x640xf32, #tpu.memory_space<vmem>>, vector<8x384xf32>
    %c104_88 = arith.constant 104 : index
    %c0_89 = arith.constant 0 : index
    %70 = vector.load %arg10[%c104_88, %c0_89] : memref<128x384xf32, #tpu.memory_space<vmem>>, vector<8x384xf32>
    tpu.vector_store %arg10[%c104_88, %c0_89], %69 {strides = array<i32>} : memref<128x384xf32, #tpu.memory_space<vmem>>, vector<8x384xf32>,
    %c8_90 = arith.constant 8 : index
    %c152_91 = arith.constant 152 : index
    %71 = vector.load %arg9[%c8_90, %c152_91] : memref<32x640xf32, #tpu.memory_space<vmem>>, vector<8x384xf32>
    %c112 = arith.constant 112 : index
    %c0_92 = arith.constant 0 : index
    %72 = vector.load %arg10[%c112, %c0_92] : memref<128x384xf32, #tpu.memory_space<vmem>>, vector<8x384xf32>
    tpu.vector_store %arg10[%c112, %c0_92], %71 {strides = array<i32>} : memref<128x384xf32, #tpu.memory_space<vmem>>, vector<8x384xf32>,
    %c0_93 = arith.constant 0 : index
    %c153 = arith.constant 153 : index
    %73 = vector.load %arg9[%c0_93, %c153] : memref<32x640xf32, #tpu.memory_space<vmem>>, vector<8x384xf32>
    %c120 = arith.constant 120 : index
    %c0_94 = arith.constant 0 : index
    %74 = vector.load %arg10[%c120, %c0_94] : memref<128x384xf32, #tpu.memory_space<vmem>>, vector<8x384xf32>
    tpu.vector_store %arg10[%c120, %c0_94], %73 {strides = array<i32>} : memref<128x384xf32, #tpu.memory_space<vmem>>, vector<8x384xf32>,
    %c0_95 = arith.constant 0 : index
    %c0_96 = arith.constant 0 : index
    %75 = vector.load %arg4[%c0_95, %c0_96] : memref<64x128xf32, #tpu.memory_space<vmem>>, vector<64x128xf32>
    %c0_97 = arith.constant 0 : index
    %c0_98 = arith.constant 0 : index
    %76 = vector.load %arg10[%c0_97, %c0_98] : memref<128x384xf32, #tpu.memory_space<vmem>>, vector<128x384xf32>
    %cst_99 = arith.constant dense<0.000000e+00> : vector<64x384xf32>
    %77 = tpu.matmul %75, %76, %cst_99 {dimension_numbers = #tpu.dot_dimension_numbers<[1], [0], [0], [1], [0, 0, 1, 1], [], []>} : vector<64x128xf32>, vector<128x384xf32>, vector<64x384xf32> -> vector<64x384xf32>
    %c0_100 = arith.constant 0 : index
    %c0_101 = arith.constant 0 : index
    %78 = vector.load %arg5[%c0_100, %c0_101] : memref<64x1xf32, #tpu.memory_space<vmem>>, vector<64x1xf32>
    %79 = vector.broadcast %78 : vector<64x1xf32> to vector<64x384xf32>
    %80 = arith.addf %77, %79 : vector<64x384xf32>
    %cst_102 = arith.constant 0.000000e+00 : f32
    %81 = vector.broadcast %cst_102 : f32 to vector<64x384xf32>
    %82 = arith.maximumf %80, %81 : vector<64x384xf32>
    %c0_103 = arith.constant 0 : index
    %c0_104 = arith.constant 0 : index
    %c0_105 = arith.constant 0 : index
    %83 = vector.load %arg7[%c0_103, %c0_104, %c0_105] : memref<1x64x384xf32, #tpu.memory_space<vmem>>, vector<1x64x384xf32>
    %84 = vector.shape_cast %83 : vector<1x64x384xf32> to vector<64x384xf32>
    %85 = vector.shape_cast %82 : vector<64x384xf32> to vector<1x64x384xf32>
    tpu.vector_store %arg7[%c0_103, %c0_104, %c0_105], %85 {strides = array<i32>} : memref<1x64x384xf32, #tpu.memory_space<vmem>>, vector<1x64x384xf32>,
    return
  }
  func.func @transform_0(%arg0: i32) -> (i32, i32, i32) {
    %c0_i32 = arith.constant 0 : i32
    %c0_i32_0 = arith.constant 0 : i32
    %c0_i32_1 = arith.constant 0 : i32
    return %arg0, %c0_i32, %c0_i32_0 : i32, i32, i32
  }
  func.func @transform_1(%arg0: i32) -> (i32, i32) {
    %c0_i32 = arith.constant 0 : i32
    %c0_i32_0 = arith.constant 0 : i32
    %c0_i32_1 = arith.constant 0 : i32
    return %c0_i32, %c0_i32_0 : i32, i32
  }
  func.func @transform_2(%arg0: i32) -> (i32, i32) {
    %c0_i32 = arith.constant 0 : i32
    %c0_i32_0 = arith.constant 0 : i32
    %c0_i32_1 = arith.constant 0 : i32
    return %c0_i32, %c0_i32_0 : i32, i32
  }
  func.func @transform_3(%arg0: i32) -> (i32, i32) {
    %c0_i32 = arith.constant 0 : i32
    %c0_i32_0 = arith.constant 0 : i32
    %c0_i32_1 = arith.constant 0 : i32
    return %c0_i32, %c0_i32_0 : i32, i32
  }
  func.func @transform_4(%arg0: i32) -> (i32, i32) {
    %c0_i32 = arith.constant 0 : i32
    %c0_i32_0 = arith.constant 0 : i32
    %c0_i32_1 = arith.constant 0 : i32
    return %c0_i32, %c0_i32_0 : i32, i32
  }
  func.func @transform_5(%arg0: i32) -> (i32, i32) {
    %c0_i32 = arith.constant 0 : i32
    %c0_i32_0 = arith.constant 0 : i32
    %c0_i32_1 = arith.constant 0 : i32
    return %c0_i32, %c0_i32_0 : i32, i32
  }
  func.func @transform_6(%arg0: i32) -> (i32, i32, i32) {
    %c0_i32 = arith.constant 0 : i32
    %c0_i32_0 = arith.constant 0 : i32
    %c0_i32_1 = arith.constant 0 : i32
    return %arg0, %c0_i32, %c0_i32_0 : i32, i32, i32
  }
}

</mosaic_0001>

<bundles_post_ra>
// kernel: tpu_custom_call.1
= control target key start
LH: loop header
LB: loop body
LE: loop exit
PB: predicated region body
PF: predicated region fallthrough
CT: control target
= control target key end

     0   :  { %11 = vsyncpa [#allocation6], 0  ;;  %s2662_s0 = inlined_call_operand.vmem [shape: f32[2,8,512], index: 0, kind: input, shape index: {}]   ;;  %s2663_s1 = inlined_call_operand.vmem [shape: f32[32,72], index: 1, kind: input, shape index: {}]   ;;  %s2664_s2 = inlined_call_operand.vmem [shape: f32[32,1], index: 2, kind: input, shape index: {}]   ;;  %s2665_s3 = inlined_call_operand.hbm [shape: f32[64,128], index: 3, kind: input, shape index: {}]   ;;  %s2666_s4 = inlined_call_operand.vmem [shape: f32[64,1], index: 4, kind: input, shape index: {}]   ;;  %s2667_s5 = inlined_call_operand.vmem [shape: f32[1,384], index: 5, kind: input, shape index: {}]   ;;  %s2668_s6 = inlined_call_operand.hbm [shape: f32[2,64,384], index: 6, kind: output, shape index: {}]  }
   0x1   :  { %12 = vsyncpa [#allocation7], 0 }
   0x2   :  { %14 = vsyncpa [#allocation7 + $0x1], 0  ;;  %s2143_s21 = smov 0   ;;  %s2145_s22 = smov 0  }
   0x3   :  { %s2147_s23 = smov 0   ;;  %s2149_s24 = smov 0  }
   0x4 LB: > { %s2164_s25 = sadd.s32 4294967295, %s2086_s24   ;;  %s1569_s26 = sadd.s32 4294967294, %s2086_s24   ;;  %s2086_s24 = sphi %s2149_s24, %s2684_s24   ;;  %s2082_s23 = sphi %s2147_s23, %s2683_s23   ;;  %s2078_s22 = sphi %s2145_s22, %s2682_s22   ;;  %s2074_s21 = sphi %s2143_s21, %s2681_s21  }
   0x5   : > { %s2168_s27 = sadd.s32 1, %s2086_s24   ;;  %s158_s28 = sadd.s32 1, %s2082_s23 }
   0x6   : > { %s155_s29 = ssub.s32 %s2086_s24, %s2168_s27  ;;  %p168_p0 = scmp.ne.s32.totalorder %s2082_s23, %s2078_s22 }
   0x7   : > { %p156_p1 = scmp.eq.s32.totalorder %s155_s29, 0  ;;  %p169_p2 = scmp.eq.s32.totalorder %s2164_s25, 1 }
   0x8   : > { %p174_p3 = scmp.ne.s32.totalorder %s2078_s22, %s2074_s21  ;;  %p175_p4 = scmp.eq.s32.totalorder %s1569_s26, 1 }
   0x9   : > { %s2179_s30 = scalar_select %p156_p1, %s2082_s23, %s158_s28  }
   0xa   : > { %p2181_p5 = por %p169_p2, %p168_p0  ;;  %p2185_p6 = por %p175_p4, %p174_p3 }
   0xb   : > { %p1570_p7 = scmp.ge.s32.totalorder %s2086_s24, 1  ;;  %p182_p8 = scmp.lt.s32.totalorder %s2086_s24, 3 }
   0xc   : > { %s2672_s7 = scalar_select %p2181_p5, 1, 0 }
   0xd   : > { %s2673_s8 = scalar_select %p2185_p6, 1, 0 }
   0xe   : > { %p2669_p9 = scmp.eq.s32.totalorder %s2164_s25, 0  ;;  %p2192_p10 = pnand %p1570_p7, %p182_p8 }
   0xf   : > { %s2088_s10 = smov [#allocation5]   ;;  %s1992_s15 = scalar_lea.hbm %s2665_s3, 1024 }
  0x10   : > { %s2674_s9 = scalar_select %p2192_p10, 1, 0 }
  0x11   : > { %s200_s11 = sshll.u32 %s2088_s10, 4  ;;  %p1798_p11 = pneg %p2192_p10  ;;  %s201_s11 = int_to_ptr.vmem [resolvable:$true] %s200_s11 }
  0x12   : > { %p1993_p13 = scmp.ne.s32.totalorder %s2665_s3, %s1992_s15  ;;  %p1999_p3 = scmp.lt.u32.totalorder %s1992_s15, %s2665_s3 }
  0x13   : > { %p2200_p12 = pnand %p2669_p9, %p1798_p11 }
  0x15   : > { %p1994_p0 = pneg %p2200_p12 }
  0x17   : > { %p1995_p1 = pnand %p1994_p0, %p1993_p13 }
  0x19   : > { %p1996_p2 = pneg %p1995_p1 }
  0x1b   : > { %p2001_p4 = pnand %p1999_p3, %p1996_p2 }
  0x1d   : > { %2004 = shalt.err (!%p2001_p4)
}
  0x1e   : > { %s2005_s20 = scalar_lea.vmem %s201_s11, 1024  ;;  %p2013_p9 = scmp.lt.s32.totalorder %s201_s11, %s201_s11 }
  0x1f   : > { %p2006_p7 = scmp.ne.s32.totalorder %s201_s11, %s2005_s20  ;;  %p2014_p6 = scmp.lt.s32.totalorder %s2005_s20, %s2005_s20 }
  0x21   : > { %p2008_p8 = pnand %p2006_p7, %p1994_p0  ;;  %p2015_p5 = por %p2014_p6, %p2013_p9 }
  0x23   : > { %p2009_p11 = pneg %p2008_p8 }
  0x25   : > { %p2016_p10 = pnand %p2015_p5, %p2009_p11 }
  0x27   : > { %2019 = shalt.err (!%p2016_p10)
}
  0x28   : > { %s2089_s26 = smov 128   ;;  %s2090_s28 = smov 8  }
  0x29   : > { %1801 = dma.hbm_to_vmem [thread:$0]  (!%p2200_p12), %s2665_s3, 1024, %s201_s11, [#allocation6], %s2089_s26, %s2089_s26, %s2090_s28  }
  0x2a   : > { %p2676_p13 = scmp.ne.s32.totalorder %s2674_s9, 0 }
  0x2b   : > { %p2677_p1 = scmp.eq.s32.totalorder (!%p2676_p13), %s2164_s25, 0 }
  0x2c   : > { %230 = sbr.rel (%p2676_p13) target bundleno = 878 (0x36e), region = 44 }
  0x33   : > { %2065 = dma.done.wait (%p2677_p1), [#allocation6], 1024   ;;  %p2678_p0 = pmov %p2677_p1 }
  0x34   : > { %p260_p5 = scmp.lt.s32.totalorder %s2164_s25, 1  ;;  %s2091_s9 = smov 126   ;;  %v2260_v4 = vld [vmem:[%s2663_s1] sm:$0xff]  ;;  %vm534_vm0 = vcmask 588800   ;;  %v2098_v5 = vmov 0.0   ;;  %v2100_v7 = vmov 0  }
  0x35   : > { %2067 = vsyncadd (%p2678_p0), [#allocation6], 4294966272  ;;  %s2092_s11 = smov 127   ;;  %s2093_s17 = smov 104   ;;  %611 = vmatprep.mubr.f32.mxu0 %v2098_v5  ;;  %1644 = vmatprep.mubr.msk.f32.mxu1 %vm534_vm0, %v2260_v4  ;;  %v512_v8 = vld [vmem:[%s2664_s2 + $0x10] sm:$0xff]  ;;  %v511_v9 = vld [vmem:[%s2664_s2 + $0x8] sm:$0xff] }
  0x36   : > { %s261_s13 = scalar_select %p260_p5, %s2164_s25, 1  ;;  %1895 = vset.pattern.permute.xlu1 %v2100_v7  ;;  %1896 = vset.pattern.permute.xlu0 %v2100_v7  ;;  %v513_v10 = vld [vmem:[%s2664_s2 + $0x18] sm:$0xff]  ;;  %v510_v11 = vld [vmem:[%s2664_s2] sm:$0xff]  ;;  %vm287_vm1 = vcmask 1039360   ;;  %vm339_vm2 = vcmask 850944   ;;  %vm313_vm3 = vcmask 1031168  }
  0x37   : > { %s2094_s18 = smov 102   ;;  %s2095_s19 = smov 103   ;;  %vm391_vm4 = vcmask 834560   ;;  %vm365_vm5 = vcmask 842752   ;;  %vm443_vm6 = vcmask 646144   ;;  %vm417_vm7 = vcmask 654336  }
  0x38   : > { %s1588_s14 = sshll.u32 %s261_s13, 5  ;;  %s2096_s20 = smov 79   ;;  %vm469_vm8 = vcmask 637952   ;;  %vm824_vm9 = vcmask 195584   ;;  %vm875_vm10 = vcmask 187392   ;;  %vm901_vm11 = vcmask 7168  }
  0x39   : > { %s2231_s16 = scalar_lea.vmem %s2662_s0, %s1588_s14  ;;  %s2097_s26 = smov 80   ;;  %vm798_vm12 = vcmask 203776   ;;  %vm1026_vm13 = vcmask 859136  }
  0x3a   : > { %v2234_v0 = vld [vmem:[%s2231_s16 + $0x8] sm:$0xff]  ;;  %v2237_v1 = vld [vmem:[%s2231_s16 + $0x10] sm:$0xff]  ;;  %v2244_v3 = vld [vmem:[%s2231_s16] sm:$0xff]  ;;  %s2099_s10 = smov 78   ;;  %s1791_s15 = smul.u32 3072, %s2164_s25 }
  0x3b   : > { %v1865_v2 = vpack.i.bf16 %v2237_v1, %v2234_v0  ;;  %v274_v6 = vld [vmem:[%s2231_s16 + $0x18] sm:$0xff]  ;;  %s2101_s16 = smov 1   ;;  %p2679_p9 = scmp.ne.s32.totalorder %s2672_s7, 0 }
  0x3c   : > { %s2106_s28 = smov [#allocation8]  }
  0x3d   : > { %1866 = vrot.lane.b32.xlu1 %v1865_v2, %s2091_s9  ;;  %1861 = vrot.lane.b32.xlu0 %v1865_v2, %s2092_s11  ;;  %s2024_s29 = sshll.u32 %s2106_s28, 4  ;;  %s2025_s29 = int_to_ptr.vmem [resolvable:$false] %s2024_s29 }
  0x41   : > { %1871 = vrot.lane.b32.xlu1 %v1865_v2, %s2093_s17  ;;  %279 = vrot.lane.b32.xlu0 %v2244_v3, %s2092_s11 }
  0x45   : > { %331 = vrot.lane.b32.xlu1 %v2244_v3, %s2093_s17  ;;  %305 = vrot.lane.b32.xlu0 %v2244_v3, %s2091_s9 }
  0x49   : > { %1881 = vrot.lane.b32.xlu1 %v1865_v2, %s2094_s18  ;;  %1876 = vrot.lane.b32.xlu0 %v1865_v2, %s2095_s19 }
  0x4d   : > { %383 = vrot.lane.b32.xlu1 %v2244_v3, %s2094_s18  ;;  %357 = vrot.lane.b32.xlu0 %v2244_v3, %s2095_s19 }
  0x51   : > { %1891 = vrot.lane.b32.xlu1 %v1865_v2, %s2096_s20  ;;  %1886 = vrot.lane.b32.xlu0 %v1865_v2, %s2097_s26 }
  0x55   : > { %435 = vrot.lane.b32.xlu1 %v2244_v3, %s2096_s20  ;;  %409 = vrot.lane.b32.xlu0 %v2244_v3, %s2097_s26 }
  0x59   : > { %465 = vrot.lane.b32.xlu1 %v2237_v1, %s2099_s10  ;;  %463 = vrot.lane.b32.xlu0 %v2234_v0, %s2099_s10 }
  0x5d   : > { %285 = vrot.lane.b32.xlu1 %v274_v6, %s2092_s11  ;;  %461 = vrot.lane.b32.xlu0 %v2244_v3, %s2099_s10 }
  0x61   : > { %337 = vrot.lane.b32.xlu1 %v274_v6, %s2093_s17  ;;  %311 = vrot.lane.b32.xlu0 %v274_v6, %s2091_s9  ;;  %s2102_s9 = smov 24  }
  0x65   : > { %389 = vrot.lane.b32.xlu1 %v274_v6, %s2094_s18  ;;  %363 = vrot.lane.b32.xlu0 %v274_v6, %s2095_s19  ;;  %s2103_s18 = smov 23  }
  0x69   : > { %441 = vrot.lane.b32.xlu1 %v274_v6, %s2096_s20  ;;  %415 = vrot.lane.b32.xlu0 %v274_v6, %s2097_s26  ;;  %s2104_s20 = smov 25   ;;  %s2105_s26 = smov 105  }
  0x6d   : > { %467 = vrot.lane.b32.xlu0 %v274_v6, %s2099_s10  ;;  %526 = vperm.xlu1 %1895, %v512_v8   ;;  %s2026_s10 = scalar_lea.vmem %s2025_s29, 6144 }
  0x71   : > { %521 = vperm.xlu1 %1895, %v511_v9   ;;  %531 = vperm.xlu0 %1896, %v513_v10  }
  0x75   : > { %516 = vperm.xlu1 %1895, %v510_v11   ;;  %v480_v11 = vld [vmem:[%s2663_s1 + $0x8] sm:$0xff] }
  0xaf   : > { %v2287_v12 = vpop.permute.xlu1 %1866  ;;  %v2289_v13 = vpop.permute.xlu0 %1861 }
  0xb0   : > { %v1864_v14 = vunpack.i.h.bf16 %v2289_v13  ;;  %v1863_v15 = vunpack.i.l.bf16 %v2289_v13  ;;  %v1869_v16 = vunpack.i.h.bf16 %v2287_v12  ;;  %v1868_v17 = vunpack.i.l.bf16 %v2287_v12 }
  0xb2   : > { %v289_v18 = vsel %vm287_vm1, %v1863_v15, %v1864_v14  ;;  %v315_v26 = vsel %vm313_vm3, %v1868_v17, %v1869_v16 }
  0xb3   : > { %v2298_v19 = vpop.permute.xlu1 %1871  ;;  %v280_v20 = vpop.permute.xlu0 %279  ;;  %v1694_v21 = vpack.c.bf16 %v289_v18, %v2234_v0 }
  0xb4   : > { %v1874_v22 = vunpack.i.h.bf16 %v2298_v19  ;;  %v1873_v23 = vunpack.i.l.bf16 %v2298_v19  ;;  %v288_v24 = vsel %vm287_vm1, %v280_v20, %v1863_v15 }
  0xb5   : > { %1695 = vmatprep.subr.bf16.mxu0 %v1694_v21  ;;  %v1696_v25 = vpack.c.bf16 %v288_v24, %v2244_v3  ;;  %v482_v21 = vld [vmem:[%s2663_s1 + $0x18] sm:$0xff] }
  0xb6   : > { %v341_v27 = vsel %vm339_vm2, %v1873_v23, %v1874_v22 }
  0xb7   : > { %v332_v28 = vpop.permute.xlu1 %331  ;;  %v306_v29 = vpop.permute.xlu0 %305  ;;  %1697 = vmatpush1.bf16.msra.mxu0 %v1696_v25  ;;  %v1698_v30 = vpack.c.bf16 %v341_v27, %v315_v26  ;;  %v735_v27 = vlaneseq }
  0xb8   : > { %v340_v31 = vsel %vm339_vm2, %v332_v28, %v1873_v23  ;;  %v314_v32 = vsel %vm313_vm3, %v306_v29, %v1868_v17  ;;  %v481_v17 = vld [vmem:[%s2663_s1 + $0x10] sm:$0xff] }
  0xb9   : > { %v1700_v33 = vpack.c.bf16 %v340_v31, %v314_v32  ;;  %1699 = vmatprep.subr.bf16.mxu0 %v1698_v30  ;;  %v736_v29 = vshrl.u32 %v735_v27, 7 }
  0xbb   : > { %v2313_v34 = vpop.permute.xlu1 %1881  ;;  %v2315_v35 = vpop.permute.xlu0 %1876  ;;  %1701 = vmatpush1.bf16.msra.mxu0 %v1700_v33  ;;  %v737_v32 = vsub.s32 0, %v736_v29  ;;  %v733_v33 = vld [vmem:[%s2667_s5] sm:$0x7] }
  0xbc   : > { %v1884_v36 = vunpack.i.h.bf16 %v2313_v34  ;;  %v1883_v37 = vunpack.i.l.bf16 %v2313_v34  ;;  %v1879_v38 = vunpack.i.h.bf16 %v2315_v35  ;;  %v1878_v39 = vunpack.i.l.bf16 %v2315_v35 }
  0xbd   : > { %v741_v35 = vsub.s32 1, %v736_v29 }
  0xbe   : > { %v367_v40 = vsel %vm365_vm5, %v1878_v39, %v1879_v38  ;;  %v393_v41 = vsel %vm391_vm4, %v1883_v37, %v1884_v36 }
  0xbf   : > { %v384_v42 = vpop.permute.xlu1 %383  ;;  %v358_v43 = vpop.permute.xlu0 %357  ;;  %v1702_v44 = vpack.c.bf16 %v393_v41, %v367_v40  ;;  %v2374_v41 = vrot.slane %v733_v33, %v741_v35 }
  0xc0   : > { %v392_v45 = vsel %vm391_vm4, %v384_v42, %v1883_v37  ;;  %v366_v46 = vsel %vm365_vm5, %v358_v43, %v1878_v39  ;;  %v2372_v37 = vrot.slane %v733_v33, %v737_v32 }
  0xc1   : > { %v1704_v47 = vpack.c.bf16 %v392_v45, %v366_v46  ;;  %1703 = vmatprep.subr.bf16.mxu0 %v1702_v44 }
  0xc3   : > { %v1892_v48 = vpop.permute.xlu1 %1891  ;;  %v1887_v49 = vpop.permute.xlu0 %1886  ;;  %1705 = vmatpush1.bf16.msra.mxu0 %v1704_v47 }
  0xc4   : > { %v1894_v50 = vunpack.i.h.bf16 %v1892_v48  ;;  %v1893_v51 = vunpack.i.l.bf16 %v1892_v48  ;;  %v1889_v52 = vunpack.i.h.bf16 %v1887_v49  ;;  %v1888_v53 = vunpack.i.l.bf16 %v1887_v49 }
  0xc6   : > { %v419_v54 = vsel %vm417_vm7, %v1888_v53, %v1889_v52  ;;  %v445_v55 = vsel %vm443_vm6, %v1893_v51, %v1894_v50 }
  0xc7   : > { %v436_v56 = vpop.permute.xlu1 %435  ;;  %v410_v57 = vpop.permute.xlu0 %409  ;;  %v1706_v58 = vpack.c.bf16 %v445_v55, %v419_v54 }
  0xc8   : > { %v444_v59 = vsel %vm443_vm6, %v436_v56, %v1893_v51  ;;  %v418_v60 = vsel %vm417_vm7, %v410_v57, %v1888_v53 }
  0xc9   : > { %v1708_v61 = vpack.c.bf16 %v444_v59, %v418_v60  ;;  %1707 = vmatprep.subr.bf16.mxu0 %v1706_v58 }
  0xcb   : > { %v466_v62 = vpop.permute.xlu1 %465  ;;  %v464_v63 = vpop.permute.xlu0 %463  ;;  %1709 = vmatpush1.bf16.msra.mxu0 %v1708_v61 }
  0xcc   : > { %v471_v0 = vsel %vm469_vm8, %v464_v63, %v466_v62 }
  0xcd   : > { %563 = vmatprep.subr.mxu0 %v471_v0 }
  0xcf   : > { %v286_v2 = vpop.permute.xlu1 %285  ;;  %v462_v3 = vpop.permute.xlu0 %461 }
  0xd0   : > { %v290_v6 = vsel %vm287_vm1, %v1864_v14, %v286_v2  ;;  %v470_v7 = vsel %vm469_vm8, %v462_v3, %v464_v63  ;;  %v745_v63 = vsub.s32 2, %v736_v29 }
  0xd1   : > { %564 = vmatpush1.msra.mxu0 %v470_v7  ;;  %v1710_v8 = vpack.c.bf16 %v290_v6, %v2237_v1 }
  0xd2   : > { %1577 = vmatmul.mubr.msk.f32.vlgmr.msra.gmra.mrb[0].mxu0 %vm534_vm0, %v2260_v4  ;;  %v746_v7 = vrot.slane %v733_v33, %v745_v63 }
  0xd3   : > { %v338_v9 = vpop.permute.xlu1 %337  ;;  %v312_v10 = vpop.permute.xlu0 %311  ;;  %1711 = vmatprep.subr.bf16.mxu1 %v1710_v8  ;;  %617 = vmatprep.mubr.f32.mxu0 %v2098_v5 }
  0xd4   : > { %v342_v13 = vsel %vm339_vm2, %v1874_v22, %v338_v9  ;;  %v316_v1 = vsel %vm313_vm3, %v1869_v16, %v312_v10  ;;  %1713 = vmatpush3.bf16.msra.mxu1 %v1710_v8 }
  0xd5   : > { %v1714_v14 = vpack.c.bf16 %v342_v13, %v316_v1 }
  0xd6   : > { %1578 = vmatmul.mubr.msk.f32.gmra.mrb[2].mxu0 %vm534_vm0, %v480_v11 }
  0xd7   : > { %v390_v4 = vpop.permute.xlu1 %389  ;;  %v364_v15 = vpop.permute.xlu0 %363  ;;  %1715 = vmatprep.subr.bf16.mxu1 %v1714_v14  ;;  %623 = vmatprep.mubr.f32.mxu0 %v2098_v5 }
  0xd8   : > { %v394_v18 = vsel %vm391_vm4, %v1884_v36, %v390_v4  ;;  %v368_v19 = vsel %vm365_vm5, %v1879_v38, %v364_v15  ;;  %1717 = vmatpush3.bf16.msra.mxu1 %v1714_v14 }
  0xd9   : > { %v1718_v12 = vpack.c.bf16 %v394_v18, %v368_v19 }
  0xda   : > { %1579 = vmatmul.mubr.msk.f32.gmra.mrb[4].mxu0 %vm534_vm0, %v481_v17 }
  0xdb   : > { %v442_v16 = vpop.permute.xlu1 %441  ;;  %v416_v20 = vpop.permute.xlu0 %415  ;;  %1719 = vmatprep.subr.bf16.mxu1 %v1718_v12  ;;  %629 = vmatprep.mubr.f32.mxu0 %v2098_v5 }
  0xdc   : > { %v446_v22 = vsel %vm443_vm6, %v1894_v50, %v442_v16  ;;  %v420_v23 = vsel %vm417_vm7, %v1889_v52, %v416_v20  ;;  %1721 = vmatpush3.bf16.msra.mxu1 %v1718_v12 }
  0xdd   : > { %v1722_v24 = vpack.c.bf16 %v446_v22, %v420_v23 }
  0xde   : > { %1580 = vmatmul.mubr.msk.f32.gmra.mrb[6].mxu0 %vm534_vm0, %v482_v21 }
  0xdf   : > { %v468_v25 = vpop.permute.xlu0 %467  ;;  %1723 = vmatprep.subr.bf16.mxu1 %v1722_v24  ;;  %1279 = vmatprep.mubr.f32.mxu0 %v2098_v5 }
  0xe0   : > { %1725 = vmatpush3.bf16.msra.mxu1 %v1722_v24  ;;  %v472_v26 = vsel %vm469_vm8, %v466_v62, %v468_v25 }
  0xe1   : > { %1642 = vmatprep.subr.mxu1 %v472_v26 }
  0xe4   : > { %1643 = vmatpush3.msra.mxu1 %v472_v26 }
  0xe5   : > { %1645 = vmatmul.mubr.msk.f32.vlgmr.msra.gmra.mrb[0].mxu1 %vm534_vm0, %v480_v11 }
  0xe6   : > { %1647 = vmatprep.mubr.msk.f32.mxu1 %vm534_vm0, %v481_v17 }
  0xe9   : > { %1648 = vmatmul.mubr.msk.f32.gmra.mrb[2].mxu1 %vm534_vm0, %v482_v21 }
  0xec   : > { %v527_v28 = vpop.permute.xlu1 %526 }
  0xf0   : > { %v522_v34 = vpop.permute.xlu1 %521  ;;  %v532_v50 = vpop.permute.xlu0 %531 }
  0xf4   : > { %v517_v55 = vpop.permute.xlu1 %516 }
 0x1a5   : > { %v2367_v30 = vpop.f32.mrb[0].mxu0 }
 0x1a6   : > { %v615_v31 = vpop.f32.mrb[1].mxu0  ;;  %v614_v29 = vadd.f32 %v2367_v30, %v517_v55 }
 0x1a7   : > { %v616_v61 = vadd.f32 %v615_v31, %v517_v55 }
 0x1a8   : > { %v721_v33 = vmax.f32 %v614_v29, 0.0 }
 0x1a9   : > { %v619_v36 = vpop.f32.mrb[2].mxu0  ;;  %v722_v2 = vmax.f32 %v616_v61, 0.0 }
 0x1aa   : > { %v620_v38 = vadd.f32 %v619_v36, %v522_v34  ;;  %v621_v39 = vpop.f32.mrb[3].mxu0  ;;  %v2434_v35 = vmul.f32 %v2372_v37, %v721_v33 }
 0x1ab   : > { %v622_v40 = vadd.f32 %v621_v39, %v522_v34  ;;  %v2400_v10 = vmul.f32 %v2374_v41, %v722_v2  ;;  %v2461_v39 = vld [vmem:[#allocation5] sm:$0xff] }
 0x1ac   : > { %v724_v42 = vmax.f32 %v620_v38, 0.0  ;;  %v1167_v38 = vld [vmem:[%s2666_s4] sm:$0xff]  ;;  %1682 = vmatprep.mubr.f32.mxu1 %v2461_v39 }
 0x1ad   : > { %v725_v43 = vmax.f32 %v622_v40, 0.0  ;;  %v625_v44 = vpop.f32.mrb[4].mxu0 }
 0x1ae   : > { %v2377_v45 = vmul.f32 %v2372_v37, %v724_v42  ;;  %v626_v46 = vadd.f32 %v625_v44, %v527_v28  ;;  %v627_v47 = vpop.f32.mrb[5].mxu0  ;;  %v1171_v42 = vld [vmem:[%s2666_s4 + $0x20] sm:$0xff]  ;;  %v1168_v44 = vld [vmem:[%s2666_s4 + $0x8] sm:$0xff] }
 0x1af   : > { %v2380_v48 = vmul.f32 %v2374_v41, %v725_v43  ;;  %v628_v49 = vadd.f32 %v627_v47, %v527_v28  ;;  %v1173_v43 = vld [vmem:[%s2666_s4 + $0x30] sm:$0xff]  ;;  %v1172_v47 = vld [vmem:[%s2666_s4 + $0x28] sm:$0xff] }
 0x1b0   : > { %v727_v51 = vmax.f32 %v626_v46, 0.0  ;;  %v1170_v46 = vld [vmem:[%s2666_s4 + $0x18] sm:$0xff] }
 0x1b1   : > { %v728_v52 = vmax.f32 %v628_v49, 0.0  ;;  %v1907_v53 = vpack.i.bf16 %v2380_v48, %v2377_v45  ;;  %v631_v54 = vpop.f32.mrb[6].mxu0  ;;  %v1174_v49 = vld [vmem:[%s2666_s4 + $0x38] sm:$0xff] }
 0x1b2   : > { %v2385_v56 = vmul.f32 %v2372_v37, %v727_v51  ;;  %v632_v57 = vadd.f32 %v631_v54, %v532_v50  ;;  %v633_v58 = vpop.f32.mrb[7].mxu0 }
 0x1b3   : > { %v2388_v59 = vmul.f32 %v2374_v41, %v728_v52  ;;  %1908 = vrot.lane.b32.xlu1 %v1907_v53, %s2101_s16  ;;  %v634_v21 = vadd.f32 %v633_v58, %v532_v50 }
 0x1b4   : > { %v730_v60 = vmax.f32 %v632_v57, 0.0 }
 0x1b5   : > { %v1912_v62 = vpack.i.bf16 %v2388_v59, %v2385_v56  ;;  %v731_v25 = vmax.f32 %v634_v21, 0.0  ;;  %v1947_v36 = vpack.i.bf16 %v2388_v59, %v2434_v35 }
 0x1b6   : > { %v2394_v0 = vmul.f32 %v2372_v37, %v730_v60  ;;  %v1977_v37 = vpack.i.bf16 %v2380_v48, %v2434_v35 }
 0x1b7   : > { %1913 = vrot.lane.b32.xlu1 %v1912_v62, %s2102_s9  ;;  %v2425_v31 = vmul.f32 %v2374_v41, %v731_v25  ;;  %v1169_v41 = vld [vmem:[%s2666_s4 + $0x10] sm:$0xff] }
 0x1b8   : > { %v1646_v3 = vpop.f32.mrb[0].mxu1  ;;  %v1922_v9 = vpack.i.bf16 %v2394_v0, %v2098_v5 }
 0x1b9   : > { %v702_v6 = vpop.f32.mrb[1].mxu1  ;;  %v708_v12 = vadd.f32 %v1646_v3, %v522_v34  ;;  %v1937_v34 = vpack.i.bf16 %v2425_v31, %v2394_v0  ;;  %v1942_v30 = vpack.i.bf16 %v2098_v5, %v2425_v31 }
 0x1ba   : > { %v703_v8 = vadd.f32 %v702_v6, %v517_v55 }
 0x1bb   : > { %1918 = vrot.lane.b32.xlu1 %v1912_v62, %s2103_s18  ;;  %v726_v24 = vmax.f32 %v708_v12, 0.0 }
 0x1bc   : > { %v723_v11 = vmax.f32 %v703_v8, 0.0  ;;  %v1649_v13 = vpop.f32.mrb[2].mxu1 }
 0x1bd   : > { %v718_v1 = vadd.f32 %v1649_v13, %v532_v50  ;;  %v712_v14 = vpop.f32.mrb[3].mxu1  ;;  %v2419_v27 = vmul.f32 %v746_v7, %v726_v24 }
 0x1be   : > { %v2402_v4 = vmul.f32 %v746_v7, %v723_v11  ;;  %v713_v15 = vadd.f32 %v712_v14, %v527_v28 }
 0x1bf   : > { %v732_v17 = vmax.f32 %v718_v1, 0.0  ;;  %1923 = vrot.lane.b32.xlu1 %v1922_v9, %s2102_s9  ;;  %v1962_v32 = vpack.i.bf16 %v2419_v27, %v2380_v48  ;;  %v1982_v40 = vpack.i.bf16 %v2377_v45, %v2419_v27 }
 0x1c0   : > { %v729_v18 = vmax.f32 %v713_v15, 0.0  ;;  %v1927_v19 = vpack.i.bf16 %v2402_v4, %v2400_v10 }
 0x1c1   : > { %v2407_v16 = vmul.f32 %v746_v7, %v732_v17 }
 0x1c2   : > { %v2409_v20 = vmul.f32 %v746_v7, %v729_v18 }
 0x1c3   : > { %1928 = vrot.lane.b32.xlu1 %v1927_v19, %s2092_s11  ;;  %v1897_v22 = vpack.i.bf16 %v2407_v16, %v2098_v5 }
 0x1c4   : > { %v1952_v23 = vpack.i.bf16 %v2407_v16, %v2409_v20  ;;  %v1902_v26 = vpack.i.bf16 %v2409_v20, %v2098_v5  ;;  %v1957_v28 = vpack.i.bf16 %v2385_v56, %v2409_v20 }
 0x1c5   : > { %1898 = vrot.lane.b32.xlu0 %v1897_v22, %s2104_s20 }
 0x1c7   : > { %1953 = vrot.lane.b32.xlu1 %v1952_v23, %s2102_s9 }
 0x1c9   : > { %1903 = vrot.lane.b32.xlu0 %v1902_v26, %s2103_s18 }
 0x1cb   : > { %1958 = vrot.lane.b32.xlu1 %v1957_v28, %s2092_s11 }
 0x1cd   : > { %1933 = vrot.lane.b32.xlu0 %v1922_v9, %s2101_s16 }
 0x1cf   : > { %1963 = vrot.lane.b32.xlu1 %v1962_v32, %s2105_s26 }
 0x1d1   : > { %1938 = vrot.lane.b32.xlu0 %v1937_v34, %s2104_s20  ;;  %s2612_s20 = scalar_lea.hbm %s2668_s6, %s1791_s15 }
 0x1d3   : > { %1018 = vrot.lane.b32.xlu1 %v2377_v45, %s2105_s26 }
 0x1d5   : > { %1943 = vrot.lane.b32.xlu0 %v1942_v30, %s2102_s9 }
 0x1d7   : > { %937 = vrot.lane.b32.xlu1 %v2098_v5, %s2092_s11 }
 0x1d9   : > { %1948 = vrot.lane.b32.xlu0 %v1947_v36, %s2092_s11 }
 0x1db   : > { %1988 = vrot.lane.b32.xlu1 %v1927_v19, %s2095_s19 }
 0x1dd   : > { %899 = vrot.lane.b32.xlu0 %v2419_v27, %s2101_s16 }
 0x1df   : > { %962 = vrot.lane.b32.xlu1 %v2407_v16, %s2101_s16 }
 0x1e1   : > { %1968 = vrot.lane.b32.xlu0 %v1942_v30, %s2101_s16 }
 0x1e3   : > { %1024 = vrot.lane.b32.xlu1 %v2098_v5, %s2105_s26 }
 0x1e5   : > { %1973 = vrot.lane.b32.xlu0 %v1927_v19, %s2093_s17 }
 0x1e7   : > { %1075 = vrot.lane.b32.xlu1 %v2098_v5, %s2093_s17 }
 0x1e9   : > { %1978 = vrot.lane.b32.xlu0 %v1977_v37, %s2093_s17 }
 0x1eb   : > { %1177 = vperm.xlu1 %1895, %v1167_v38  }
 0x1ed   : > { %1983 = vrot.lane.b32.xlu0 %v1982_v40, %s2093_s17 }
 0x1ef   : > { %1187 = vperm.xlu1 %1895, %v1169_v41  }
 0x1f1   : > { %1094 = vrot.lane.b32.xlu0 %v2434_v35, %s2095_s19 }
 0x1f3   : > { %1197 = vperm.xlu1 %1895, %v1171_v42  }
 0x1f5   : > { %999 = vrot.lane.b32.xlu0 %v2098_v5, %s2092_s11 }
 0x1f7   : > { %1207 = vperm.xlu1 %1895, %v1173_v43  }
 0x1f9   : > { %1050 = vrot.lane.b32.xlu0 %v2098_v5, %s2093_s17 }
 0x1fd   : > { %1100 = vrot.lane.b32.xlu0 %v2098_v5, %s2095_s19  ;;  %s257_s19 = sand.u32 1, %s2078_s22  }
 0x1fe   : > { %s1790_s13 = smul.u32 192, %s257_s19  ;;  %s2620_s25 = scalar_lea.sflag [#allocation7], %s257_s19 }
 0x200   : > { %s2583_s14 = scalar_lea.vmem [#allocation8], %s1790_s13 }
 0x201   : > { %1182 = vperm.xlu0 %1896, %v1168_v44   ;;  %s1495_s12 = sshll.u32 %s2583_s14, 4  ;;  %s2614_s12 = int_to_ptr.vmem [resolvable:$true] %s1495_s12 }
 0x202   : > { %s2020_s26 = scalar_lea.vmem %s2614_s12, 3072  ;;  %p2027_p2 = scmp.lt.s32.totalorder %s2614_s12, %s2025_s29 }
 0x203   : > { %p2021_p6 = scmp.ne.s32.totalorder %s2614_s12, %s2020_s26  ;;  %p2028_p3 = scmp.lt.s32.totalorder %s2026_s10, %s2020_s26 }
 0x205   : > { %1192 = vperm.xlu0 %1896, %v1170_v46   ;;  %p2022_p10 = pnand %p2021_p6, %p2679_p9  ;;  %p2029_p4 = por %p2028_p3, %p2027_p2 }
 0x207   : > { %p2023_p12 = pneg %p2022_p10 }
 0x209   : > { %1202 = vperm.xlu0 %1896, %v1172_v47   ;;  %p2030_p7 = pnand %p2029_p4, %p2023_p12 }
 0x20d   : > { %1212 = vperm.xlu0 %1896, %v1174_v49  }
 0x225   : > { %v2496_v50 = vpop.permute.xlu1 %1908 }
 0x226   : > { %v1911_v7 = vunpack.i.h.bf16 %v2496_v50  ;;  %v1910_v8 = vunpack.i.l.bf16 %v2496_v50 }
 0x228   : > { %v903_v37 = vsel %vm901_vm11, %v1910_v8, %v1911_v7 }
 0x229   : > { %v1914_v51 = vpop.permute.xlu1 %1913 }
 0x22a   : > { %v1916_v61 = vunpack.i.h.bf16 %v1914_v51  ;;  %v1915_v62 = vunpack.i.l.bf16 %v1914_v51 }
 0x22c   : > { %v826_v11 = vsel %vm824_vm9, %v1915_v62, %v1916_v61 }
 0x22d   : > { %v1919_v52 = vpop.permute.xlu1 %1918 }
 0x22e   : > { %v1921_v17 = vunpack.i.h.bf16 %v1919_v52  ;;  %v1920_v18 = vunpack.i.l.bf16 %v1919_v52 }
 0x230   : > { %v877_v43 = vsel %vm875_vm10, %v1920_v18, %v1921_v17 }
 0x231   : > { %v1924_v53 = vpop.permute.xlu1 %1923 }
 0x232   : > { %v1925_v2 = vunpack.i.l.bf16 %v1924_v53  ;;  %v1926_v34 = vunpack.i.h.bf16 %v1924_v53 }
 0x234   : > { %v825_v19 = vsel %vm824_vm9, %v1925_v2, %v1915_v62 }
 0x235   : > { %v2498_v54 = vpop.permute.xlu1 %1928 }
 0x236   : > { %v1931_v38 = vunpack.i.h.bf16 %v2498_v54  ;;  %v1930_v44 = vunpack.i.l.bf16 %v2498_v54  ;;  %v1734_v54 = vpack.c.bf16 %v2400_v10, %v903_v37 }
 0x237   : > { %v1899_v55 = vpop.permute.xlu0 %1898 }
 0x238   : > { %v1901_v13 = vunpack.i.h.bf16 %v1899_v55  ;;  %v1900_v1 = vunpack.i.l.bf16 %v1899_v55  ;;  %v940_v62 = vsel %vm287_vm1, %v1930_v44, %v1931_v38 }
 0x239   : > { %v1954_v57 = vpop.permute.xlu1 %1953  ;;  %v1738_v10 = vpack.c.bf16 %v940_v62, %v2380_v48  ;;  %v1112_v62 = vld [vmem:[#allocation5 + $0x8] sm:$0xff] }
 0x23a   : > { %v1955_v6 = vunpack.i.l.bf16 %v1954_v57  ;;  %v1956_v40 = vunpack.i.h.bf16 %v1954_v57 }
 0x23b   : > { %v1904_v58 = vpop.permute.xlu0 %1903 }
 0x23c   : > { %v1905_v12 = vunpack.i.l.bf16 %v1904_v58  ;;  %v827_v25 = vsel %vm824_vm9, %v1916_v61, %v1955_v6  ;;  %v1906_v26 = vunpack.i.h.bf16 %v1904_v58 }
 0x23d   : > { %v2500_v60 = vpop.permute.xlu1 %1958 }
 0x23e   : > { %v876_v46 = vsel %vm875_vm10, %v1905_v12, %v1920_v18  ;;  %v878_v55 = vsel %vm875_vm10, %v1921_v17, %v1906_v26 }
 0x23f   : > { %v2502_v63 = vpop.permute.xlu0 %1933 }
 0x240   : > { %v1935_v41 = vunpack.i.l.bf16 %v2502_v63 }
 0x241   : > { %v2504_v3 = vpop.permute.xlu1 %1963 }
 0x242   : > { %v902_v58 = vsel %vm901_vm11, %v1935_v41, %v1910_v8 }
 0x243   : > { %v1939_v9 = vpop.permute.xlu0 %1938 }
 0x244   : > { %v1941_v14 = vunpack.i.h.bf16 %v1939_v9  ;;  %v1940_v15 = vunpack.i.l.bf16 %v1939_v9  ;;  %v1736_v9 = vpack.c.bf16 %v2434_v35, %v902_v58  ;;  %v1936_v35 = vunpack.i.h.bf16 %v2502_v63 }
 0x245   : > { %v2510_v21 = vpop.permute.xlu1 %1018  ;;  %v1961_v63 = vunpack.i.h.bf16 %v2500_v60 }
 0x246   : > { %v799_v22 = vsel %vm798_vm12, %v1900_v1, %v1940_v15  ;;  %v800_v23 = vsel %vm798_vm12, %v1940_v15, %v1941_v14  ;;  %v801_v24 = vsel %vm798_vm12, %v1941_v14, %v1901_v13  ;;  %v1960_v15 = vunpack.i.l.bf16 %v2500_v60 }
 0x247   : > { %v1728_v28 = vpack.c.bf16 %v825_v19, %v799_v22  ;;  %v1944_v29 = vpop.permute.xlu0 %1943  ;;  %v1726_v32 = vpack.c.bf16 %v826_v11, %v800_v23  ;;  %v1758_v33 = vpack.c.bf16 %v827_v25, %v801_v24 }
 0x248   : > { %v1946_v30 = vunpack.i.h.bf16 %v1944_v29  ;;  %v1945_v36 = vunpack.i.l.bf16 %v1944_v29  ;;  %v1965_v29 = vunpack.i.l.bf16 %v2504_v3 }
 0x249   : > { %1727 = vmatprep.subr.bf16.mxu0 %v1726_v32  ;;  %v938_v42 = vpop.permute.xlu1 %937  ;;  %1759 = vmatprep.subr.bf16.mxu1 %v1758_v33 }
 0x24a   : > { %v850_v47 = vsel %vm824_vm9, %v1946_v30, %v1926_v34  ;;  %1729 = vmatpush1.bf16.msra.mxu0 %v1728_v28  ;;  %1761 = vmatpush3.bf16.msra.mxu1 %v1758_v33  ;;  %v851_v49 = vsel %vm824_vm9, %v1926_v34, %v1945_v36  ;;  %v852_v53 = vsel %vm824_vm9, %v1945_v36, %v1956_v40  ;;  %v1966_v28 = vunpack.i.h.bf16 %v2504_v3 }
 0x24b   : > { %v1732_v50 = vpack.c.bf16 %v876_v46, %v850_v47  ;;  %v1949_v51 = vpop.permute.xlu0 %1948  ;;  %v1730_v52 = vpack.c.bf16 %v877_v43, %v851_v49  ;;  %v1762_v57 = vpack.c.bf16 %v878_v55, %v852_v53  ;;  %v941_v11 = vsel %vm287_vm1, %v1931_v38, %v938_v42 }
 0x24c   : > { %v1950_v61 = vunpack.i.l.bf16 %v1949_v51  ;;  %v1951_v14 = vunpack.i.h.bf16 %v1949_v51  ;;  %v1770_v17 = vpack.c.bf16 %v941_v11, %v2419_v27  ;;  %v1028_v3 = vsel %vm1026_vm13, %v1965_v29, %v1966_v28 }
 0x24d   : > { %1731 = vmatprep.subr.bf16.mxu0 %v1730_v52  ;;  %1763 = vmatprep.subr.bf16.mxu1 %v1762_v57  ;;  %v2526_v2 = vpop.permute.xlu1 %1988  ;;  %v1027_v38 = vsel %vm1026_vm13, %v2510_v21, %v1965_v29 }
 0x24e   : > { %1733 = vmatpush1.bf16.msra.mxu0 %v1732_v50  ;;  %1765 = vmatpush3.bf16.msra.mxu1 %v1762_v57  ;;  %v939_v8 = vsel %vm287_vm1, %v1950_v61, %v1930_v44  ;;  %v1002_v27 = vsel %vm287_vm1, %v1951_v14, %v1960_v15  ;;  %v1001_v34 = vsel %vm287_vm1, %v1961_v63, %v1951_v14  ;;  %v1991_v40 = vunpack.i.h.bf16 %v2526_v2  ;;  %v1116_v14 = vld [vmem:[#allocation5 + $0x28] sm:$0xff] }
 0x24f   : > { %1735 = vmatprep.subr.bf16.mxu0 %v1734_v54  ;;  %v900_v6 = vpop.permute.xlu0 %899  ;;  %v1740_v19 = vpack.c.bf16 %v939_v8, %v2377_v45  ;;  %v1746_v30 = vpack.c.bf16 %v1002_v27, %v2425_v31  ;;  %v1990_v41 = vunpack.i.l.bf16 %v2526_v2 }
 0x250   : > { %v904_v13 = vsel %vm901_vm11, %v1911_v7, %v900_v6 }
 0x251   : > { %v1766_v1 = vpack.c.bf16 %v2402_v4, %v904_v13  ;;  %v963_v22 = vpop.permute.xlu1 %962  ;;  %v1103_v49 = vsel %vm365_vm5, %v1990_v41, %v1991_v40 }
 0x252   : > { %1737 = vmatpush1.bf16.msra.mxu0 %v1736_v9 }
 0x253   : > { %1767 = vmatprep.subr.bf16.mxu1 %v1766_v1  ;;  %v1969_v18 = vpop.permute.xlu0 %1968  ;;  %1739 = vmatprep.subr.bf16.mxu0 %v1738_v10  ;;  %v1115_v10 = vld [vmem:[#allocation5 + $0x20] sm:$0xff] }
 0x254   : > { %v1971_v7 = vunpack.i.h.bf16 %v1969_v18  ;;  %v1970_v12 = vunpack.i.l.bf16 %v1969_v18  ;;  %1769 = vmatpush3.bf16.msra.mxu1 %v1766_v1  ;;  %v1114_v1 = vld [vmem:[#allocation5 + $0x18] sm:$0xff] }
 0x255   : > { %1771 = vmatprep.subr.bf16.mxu1 %v1770_v17  ;;  %v1025_v58 = vpop.permute.xlu1 %1024 }
 0x256   : > { %v964_v48 = vsel %vm901_vm11, %v1971_v7, %v1936_v35  ;;  %1741 = vmatpush1.bf16.msra.mxu0 %v1740_v19  ;;  %v965_v4 = vsel %vm901_vm11, %v1936_v35, %v1970_v12  ;;  %v966_v23 = vsel %vm901_vm11, %v1970_v12, %v963_v22  ;;  %v1029_v2 = vsel %vm1026_vm13, %v1966_v28, %v1025_v58 }
 0x257   : > { %v1744_v45 = vpack.c.bf16 %v2385_v56, %v964_v48  ;;  %v1974_v24 = vpop.permute.xlu0 %1973  ;;  %v1742_v25 = vpack.c.bf16 %v2388_v59, %v965_v4  ;;  %v1774_v26 = vpack.c.bf16 %v2409_v20, %v966_v23  ;;  %v1748_v20 = vpack.c.bf16 %v1001_v34, %v2394_v0 }
 0x258   : > { %v1976_v32 = vunpack.i.h.bf16 %v1974_v24  ;;  %v1975_v33 = vunpack.i.l.bf16 %v1974_v24  ;;  %1773 = vmatpush3.bf16.msra.mxu1 %v1770_v17  ;;  %v1118_v17 = vld [vmem:[#allocation5 + $0x38] sm:$0xff] }
 0x259   : > { %1743 = vmatprep.subr.bf16.mxu0 %v1742_v25  ;;  %1775 = vmatprep.subr.bf16.mxu1 %v1774_v26  ;;  %v1076_v9 = vpop.permute.xlu1 %1075 }
 0x25a   : > { %1745 = vmatpush1.bf16.msra.mxu0 %v1744_v45  ;;  %v1053_v56 = vsel %vm339_vm2, %v1975_v33, %v1976_v32 }
 0x25b   : > { %v1979_v59 = vpop.permute.xlu0 %1978  ;;  %1747 = vmatprep.subr.bf16.mxu0 %v1746_v30  ;;  %v1750_v37 = vpack.c.bf16 %v1053_v56, %v1028_v3 }
 0x25c   : > { %v1980_v36 = vunpack.i.l.bf16 %v1979_v59  ;;  %1777 = vmatpush3.bf16.msra.mxu1 %v1774_v26  ;;  %v1981_v44 = vunpack.i.h.bf16 %v1979_v59 }
 0x25e   : > { %v1052_v31 = vsel %vm339_vm2, %v1980_v36, %v1975_v33  ;;  %1749 = vmatpush1.bf16.msra.mxu0 %v1748_v20 }
 0x25f   : > { %v1752_v42 = vpack.c.bf16 %v1052_v31, %v1027_v38  ;;  %v1984_v43 = vpop.permute.xlu0 %1983  ;;  %1751 = vmatprep.subr.bf16.mxu0 %v1750_v37 }
 0x260   : > { %v1986_v0 = vunpack.i.h.bf16 %v1984_v43  ;;  %v1985_v46 = vunpack.i.l.bf16 %v1984_v43 }
 0x262   : > { %1753 = vmatpush1.bf16.msra.mxu0 %v1752_v42  ;;  %v1078_v47 = vsel %vm339_vm2, %v1981_v44, %v1985_v46  ;;  %v1077_v51 = vsel %vm339_vm2, %v1986_v0, %v1981_v44 }
 0x263   : > { %v1095_v50 = vpop.permute.xlu0 %1094  ;;  %v1754_v21 = vpack.c.bf16 %v1103_v49, %v1078_v47 }
 0x264   : > { %v1102_v52 = vsel %vm365_vm5, %v1095_v50, %v1990_v41 }
 0x265   : > { %v1756_v53 = vpack.c.bf16 %v1102_v52, %v1077_v51  ;;  %1755 = vmatprep.subr.bf16.mxu0 %v1754_v21 }
 0x267   : > { %v1000_v55 = vpop.permute.xlu0 %999  ;;  %1757 = vmatpush1.bf16.msra.mxu0 %v1756_v53 }
 0x268   : > { %v1003_v57 = vsel %vm287_vm1, %v1960_v15, %v1000_v55  ;;  %v1117_v15 = vld [vmem:[#allocation5 + $0x30] sm:$0xff] }
 0x269   : > { %v1778_v61 = vpack.c.bf16 %v1003_v57, %v2407_v16  ;;  %v1113_v16 = vld [vmem:[#allocation5 + $0x10] sm:$0xff] }
 0x26a   : > { %1280 = vmatmul.mubr.f32.vlgmr.msra.gmra.mrb[8].mxu0 %v2461_v39  ;;  %v1079_v39 = vsel %vm339_vm2, %v1985_v46, %v1076_v9  ;;  %v1178_v18 = vpop.permute.xlu1 %1177 }
 0x26b   : > { %v1051_v54 = vpop.permute.xlu0 %1050  ;;  %1779 = vmatprep.subr.bf16.mxu1 %v1778_v61  ;;  %1285 = vmatprep.mubr.f32.mxu0 %v2098_v5 }
 0x26c   : > { %v1054_v6 = vsel %vm339_vm2, %v1976_v32, %v1051_v54  ;;  %1781 = vmatpush3.bf16.msra.mxu1 %v1778_v61 }
 0x26d   : > { %v1782_v11 = vpack.c.bf16 %v1054_v6, %v1029_v2 }
 0x26e   : > { %1286 = vmatmul.mubr.f32.gmra.mrb[10].mxu0 %v1112_v62  ;;  %v1188_v24 = vpop.permute.xlu1 %1187 }
 0x26f   : > { %v1101_v60 = vpop.permute.xlu0 %1100  ;;  %1783 = vmatprep.subr.bf16.mxu1 %v1782_v11  ;;  %1291 = vmatprep.mubr.f32.mxu0 %v2098_v5 }
 0x270   : > { %v1104_v13 = vsel %vm365_vm5, %v1991_v40, %v1101_v60  ;;  %1785 = vmatpush3.bf16.msra.mxu1 %v1782_v11 }
 0x271   : > { %v1786_v8 = vpack.c.bf16 %v1104_v13, %v1079_v39 }
 0x272   : > { %1292 = vmatmul.mubr.f32.gmra.mrb[12].mxu0 %v1113_v16  ;;  %v1198_v31 = vpop.permute.xlu1 %1197 }
 0x273   : > { %1787 = vmatprep.subr.bf16.mxu1 %v1786_v8  ;;  %1297 = vmatprep.mubr.f32.mxu0 %v2098_v5 }
 0x274   : > { %1789 = vmatpush3.bf16.msra.mxu1 %v1786_v8 }
 0x276   : > { %1298 = vmatmul.mubr.f32.gmra.mrb[14].mxu0 %v1114_v1 }
 0x277   : > { %1683 = vmatmul.mubr.f32.vlgmr.msra.gmra.mrb[4].mxu1 %v1112_v62  ;;  %1303 = vmatprep.mubr.f32.mxu0 %v2098_v5 }
 0x278   : > { %1685 = vmatprep.mubr.f32.mxu1 %v1113_v16  ;;  %v1208_v16 = vpop.permute.xlu1 %1207 }
 0x27a   : > { %1304 = vmatmul.mubr.f32.gmra.mrb[16].mxu0 %v1115_v10 }
 0x27b   : > { %1686 = vmatmul.mubr.f32.gmra.mrb[6].mxu1 %v1114_v1  ;;  %1309 = vmatprep.mubr.f32.mxu0 %v2098_v5 }
 0x27c   : > { %1688 = vmatprep.mubr.f32.mxu1 %v1115_v10 }
 0x27e   : > { %1310 = vmatmul.mubr.f32.gmra.mrb[18].mxu0 %v1116_v14 }
 0x27f   : > { %1689 = vmatmul.mubr.f32.gmra.mrb[8].mxu1 %v1116_v14  ;;  %1315 = vmatprep.mubr.f32.mxu0 %v2098_v5 }
 0x280   : > { %1691 = vmatprep.mubr.f32.mxu1 %v1117_v15  ;;  %v1183_v48 = vpop.permute.xlu0 %1182 }
 0x282   : > { %1316 = vmatmul.mubr.f32.gmra.mrb[20].mxu0 %v1117_v15 }
 0x283   : > { %1692 = vmatmul.mubr.f32.gmra.mrb[10].mxu1 %v1118_v17  ;;  %1321 = vmatprep.mubr.f32.mxu0 %v2098_v5 }
 0x284   : > { %v1193_v34 = vpop.permute.xlu0 %1192 }
 0x286   : > { %1322 = vmatmul.mubr.f32.gmra.mrb[22].mxu0 %v1118_v17 }
 0x288   : > { %v1203_v50 = vpop.permute.xlu0 %1202 }
 0x28c   : > { %v1213_v8 = vpop.permute.xlu0 %1212 }
 0x33d   : > { %v1281_v35 = vpop.f32.mrb[8].mxu0 }
 0x33e   : > { %v1282_v19 = vadd.f32 %v1281_v35, %v1178_v18  ;;  %v1283_v7 = vpop.f32.mrb[9].mxu0 }
 0x33f   : > { %v1284_v12 = vadd.f32 %v1283_v7, %v1178_v18 }
 0x340   : > { %v1433_v22 = vmax.f32 %v1282_v19, 0.0 }
 0x341   : > { %v1434_v4 = vmax.f32 %v1284_v12, 0.0  ;;  %v1287_v23 = vpop.f32.mrb[10].mxu0 }
 0x342   : > { %1457 = vst [vmem:[%s2583_s14] sm:$0xff] %v1433_v22  ;;  %v1288_v5 = vadd.f32 %v1287_v23, %v1183_v48  ;;  %v1289_v27 = vpop.f32.mrb[11].mxu0 }
 0x343   : > { %1458 = vst [vmem:[%s2583_s14 + $0x8] sm:$0xff] %v1434_v4  ;;  %v1290_v63 = vadd.f32 %v1289_v27, %v1183_v48 }
 0x344   : > { %v1436_v45 = vmax.f32 %v1288_v5, 0.0 }
 0x345   : > { %v1437_v25 = vmax.f32 %v1290_v63, 0.0  ;;  %v1293_v26 = vpop.f32.mrb[12].mxu0 }
 0x346   : > { %1460 = vst [vmem:[%s2583_s14 + $0x18] sm:$0xff] %v1436_v45  ;;  %v1294_v28 = vadd.f32 %v1293_v26, %v1188_v24  ;;  %v1295_v29 = vpop.f32.mrb[13].mxu0 }
 0x347   : > { %1461 = vst [vmem:[%s2583_s14 + $0x20] sm:$0xff] %v1437_v25  ;;  %v1296_v32 = vadd.f32 %v1295_v29, %v1188_v24 }
 0x348   : > { %v1439_v33 = vmax.f32 %v1294_v28, 0.0 }
 0x349   : > { %v1440_v30 = vmax.f32 %v1296_v32, 0.0  ;;  %v1299_v56 = vpop.f32.mrb[14].mxu0 }
 0x34a   : > { %1463 = vst [vmem:[%s2583_s14 + $0x30] sm:$0xff] %v1439_v33  ;;  %v1300_v59 = vadd.f32 %v1299_v56, %v1193_v34  ;;  %v1301_v20 = vpop.f32.mrb[15].mxu0  ;;  %v1684_v36 = vpop.f32.mrb[4].mxu1 }
 0x34b   : > { %1464 = vst [vmem:[%s2583_s14 + $0x38] sm:$0xff] %v1440_v30  ;;  %v1302_v3 = vadd.f32 %v1301_v20, %v1193_v34  ;;  %v1400_v37 = vadd.f32 %v1684_v36, %v1183_v48  ;;  %v1394_v38 = vpop.f32.mrb[5].mxu1 }
 0x34c   : > { %v1442_v40 = vmax.f32 %v1300_v59, 0.0  ;;  %v1395_v41 = vadd.f32 %v1394_v38, %v1178_v18 }
 0x34d   : > { %v1443_v42 = vmax.f32 %v1302_v3, 0.0  ;;  %v1438_v43 = vmax.f32 %v1400_v37, 0.0  ;;  %v1305_v44 = vpop.f32.mrb[16].mxu0 }
 0x34e   : > { %1466 = vst [vmem:[%s2583_s14 + $0x48] sm:$0xff] %v1442_v40  ;;  %v1435_v0 = vmax.f32 %v1395_v41, 0.0  ;;  %v1306_v46 = vadd.f32 %v1305_v44, %v1198_v31  ;;  %v1307_v47 = vpop.f32.mrb[17].mxu0  ;;  %v1687_v49 = vpop.f32.mrb[6].mxu1 }
 0x34f   : > { %1467 = vst [vmem:[%s2583_s14 + $0x50] sm:$0xff] %v1443_v42  ;;  %1462 = vst [vmem:[%s2583_s14 + $0x28] sm:$0xff] %v1438_v43  ;;  %v1308_v21 = vadd.f32 %v1307_v47, %v1198_v31  ;;  %v1410_v51 = vadd.f32 %v1687_v49, %v1193_v34  ;;  %v1404_v52 = vpop.f32.mrb[7].mxu1 }
 0x350   : > { %1459 = vst [vmem:[%s2583_s14 + $0x10] sm:$0xff] %v1435_v0  ;;  %v1445_v53 = vmax.f32 %v1306_v46, 0.0  ;;  %v1405_v55 = vadd.f32 %v1404_v52, %v1188_v24 }
 0x351   : > { %v1446_v57 = vmax.f32 %v1308_v21, 0.0  ;;  %v1444_v58 = vmax.f32 %v1410_v51, 0.0  ;;  %v1311_v61 = vpop.f32.mrb[18].mxu0 }
 0x352   : > { %1469 = vst [vmem:[%s2583_s14 + $0x60] sm:$0xff] %v1445_v53  ;;  %v1441_v54 = vmax.f32 %v1405_v55, 0.0  ;;  %v1312_v62 = vadd.f32 %v1311_v61, %v1203_v50  ;;  %v1313_v2 = vpop.f32.mrb[19].mxu0  ;;  %v1690_v6 = vpop.f32.mrb[8].mxu1 }
 0x353   : > { %1470 = vst [vmem:[%s2583_s14 + $0x68] sm:$0xff] %v1446_v57  ;;  %1468 = vst [vmem:[%s2583_s14 + $0x58] sm:$0xff] %v1444_v58  ;;  %v1314_v9 = vadd.f32 %v1313_v2, %v1203_v50  ;;  %v1420_v11 = vadd.f32 %v1690_v6, %v1203_v50  ;;  %v1414_v60 = vpop.f32.mrb[9].mxu1 }
 0x354   : > { %1465 = vst [vmem:[%s2583_s14 + $0x40] sm:$0xff] %v1441_v54  ;;  %v1448_v39 = vmax.f32 %v1312_v62, 0.0  ;;  %v1415_v13 = vadd.f32 %v1414_v60, %v1198_v31 }
 0x355   : > { %v1449_v1 = vmax.f32 %v1314_v9, 0.0  ;;  %v1450_v10 = vmax.f32 %v1420_v11, 0.0  ;;  %v1317_v14 = vpop.f32.mrb[20].mxu0 }
 0x356   : > { %1472 = vst [vmem:[%s2583_s14 + $0x78] sm:$0xff] %v1448_v39  ;;  %v1447_v15 = vmax.f32 %v1415_v13, 0.0  ;;  %v1318_v17 = vadd.f32 %v1317_v14, %v1208_v16  ;;  %v1319_v18 = vpop.f32.mrb[21].mxu0  ;;  %v1693_v35 = vpop.f32.mrb[10].mxu1 }
 0x357   : > { %1473 = vst [vmem:[%s2583_s14 + $0x80] sm:$0xff] %v1449_v1  ;;  %1474 = vst [vmem:[%s2583_s14 + $0x88] sm:$0xff] %v1450_v10  ;;  %v1320_v19 = vadd.f32 %v1319_v18, %v1208_v16  ;;  %v1430_v7 = vadd.f32 %v1693_v35, %v1213_v8  ;;  %v1424_v12 = vpop.f32.mrb[11].mxu1 }
 0x358   : > { %1471 = vst [vmem:[%s2583_s14 + $0x70] sm:$0xff] %v1447_v15  ;;  %v1451_v22 = vmax.f32 %v1318_v17, 0.0  ;;  %v1425_v48 = vadd.f32 %v1424_v12, %v1208_v16 }
 0x359   : > { %v1452_v4 = vmax.f32 %v1320_v19, 0.0  ;;  %v1456_v23 = vmax.f32 %v1430_v7, 0.0  ;;  %v1323_v5 = vpop.f32.mrb[22].mxu0 }
 0x35a   : > { %1475 = vst [vmem:[%s2583_s14 + $0x90] sm:$0xff] %v1451_v22  ;;  %v1453_v27 = vmax.f32 %v1425_v48, 0.0  ;;  %v1324_v63 = vadd.f32 %v1323_v5, %v1213_v8  ;;  %v1325_v45 = vpop.f32.mrb[23].mxu0 }
 0x35b   : > { %1476 = vst [vmem:[%s2583_s14 + $0x98] sm:$0xff] %v1452_v4  ;;  %1480 = vst [vmem:[%s2583_s14 + $0xb8] sm:$0xff] %v1456_v23  ;;  %v1326_v24 = vadd.f32 %v1325_v45, %v1213_v8 }
 0x35c   : > { %1477 = vst [vmem:[%s2583_s14 + $0xa0] sm:$0xff] %v1453_v27  ;;  %v1454_v25 = vmax.f32 %v1324_v63, 0.0 }
 0x35d   : > { %v1455_v26 = vmax.f32 %v1326_v24, 0.0 }
 0x35e   : > { %1478 = vst [vmem:[%s2583_s14 + $0xa8] sm:$0xff] %v1454_v25 }
 0x35f   : > { %1479 = vst [vmem:[%s2583_s14 + $0xb0] sm:$0xff] %v1455_v26 }
 0x360   : > { %2033 = shalt.err (!%p2030_p7)
}
 0x361   : > { %s2034_s11 = scalar_lea.hbm %s2612_s20, 3072  ;;  %s2038_s13 = scalar_lea.hbm %s2668_s6, 6144 }
 0x362   : > { %p2035_p8 = scmp.ne.s32.totalorder %s2612_s20, %s2034_s11  ;;  %p2039_p1 = scmp.lt.u32.totalorder %s2612_s20, %s2668_s6 }
 0x363   : > { %p2040_p0 = scmp.lt.u32.totalorder %s2038_s13, %s2034_s11  ;;  %p2042_p6 = scmp.lt.u32.totalorder %s2034_s11, %s2612_s20 }
 0x364   : > { %p2036_p11 = pnand %p2035_p8, %p2679_p9 }
 0x365   : > { %p2041_p5 = por %p2040_p0, %p2039_p1 }
 0x366   : > { %p2037_p13 = pneg %p2036_p11 }
 0x367   : > { %p2043_p10 = por %p2042_p6, %p2041_p5 }
 0x369   : > { %p2044_p12 = pnand %p2043_p10, %p2037_p13 }
 0x36b   : > { %2047 = shalt.err (!%p2044_p12)
}
 0x36c   : > { %s2107_s16 = smov 384  }
 0x36d   : > { %1796 = dma.vmem_to_hbm [thread:$0]  (%p2679_p9), %s2614_s12, 3072, %s2612_s20, %s2620_s25, %s2107_s16, %s2107_s16, %s2102_s9  }
 0x36e PF: > { %p1808_p2 = scmp.ge.s32.totalorder %s2086_s24, 2  ;;  %s1510_s18 = sand.u32 1, %s2074_s21  }
 0x36f   : > { %p2680_p3 = scmp.ne.s32.totalorder %s2673_s8, 0  ;;  %s1511_s26 = scalar_lea.sflag [#allocation7], %s1510_s18 }
 0x371   : > { %p1803_p4 = pnand %p1808_p2, %p2680_p3 }
 0x373   : > { %2069 = dma.done.wait (!%p1803_p4), %s1511_s26, 3072  }
 0x374   : > { %2071 = vsyncadd (!%p1803_p4), %s1511_s26, 4294964224  ;;  %p17_p7 = scmp.ge.s32.totalorder %s2168_s27, 4   ;;  %s2681_s21 = smov %s2078_s22 }
 0x375   : > { %s2682_s22 = smov %s2082_s23  ;;  %s2683_s23 = smov %s2179_s30 }
 0x376   : > { %s2684_s24 = smov %s2168_s27  ;;  %19 = sbr.rel (!%p17_p7) target bundleno = 4 (0x4), region = 84 }
 0x37d   :  { %1516 = vsyncpa [#allocation6], 1 }
 0x37e   :  { %1518 = vsyncpa [#allocation6 + $0x1], 1 }
 0x37f   :  { %1519 = vsyncpa [#allocation7], 1 }
 0x380   :  { %1521 = vsyncpa [#allocation7 + $0x1], 1 }

</bundles_post_ra>
